<compile_context>
chip_gen: v6e
topology: v6e:2x2x1
jax: 0.10.0
libtpu: 0.0.40
codegen_flags: <defaults>
</compile_context>

<pallas_src>
import jax
import jax.numpy as jnp
from jax.experimental import pallas as pl
from jax.experimental.pallas import tpu as pltpu

_VMEM = pl.BlockSpec(memory_space=pltpu.MemorySpace.VMEM)
_ANY = pl.BlockSpec(memory_space=pl.ANY)
_BN_EPS = 1e-5
_N_BLOCKS = 9          # Linear+BN+ReLU blocks (block1..block9)
_SHIFT_PAD = 512       # widest block output; lane width of the shift slab


# ---------------- fused kernel ------------------------------------------------

def _make_kernel(batch_pad, batch_valid, out_dims):
    """Build the fused kernel closure for the static (padded) batch size."""

    def kernel(x_ref, w1, w2, w3, w4, w5, w6, w7, shift_ref,
               w8_hbm, w9_hbm, w10_ref, b10_ref,
               o_ref, w8_buf, w9_buf, dma_sem):
        # Kick off the two dominant weight DMAs so they overlap blocks 1-7.
        cp8 = pltpu.make_async_copy(w8_hbm, w8_buf, dma_sem.at[0])
        cp9 = pltpu.make_async_copy(w9_hbm, w9_buf, dma_sem.at[1])
        cp8.start()
        cp9.start()

        def shift(i):
            row = shift_ref[i:i + 1, :]          # (1, 512) lane-aligned load
            return row[:, :out_dims[i]]          # static lane slice

        def stage(a, w, i):
            # bf16 MXU matmul, f32 accumulation; f32 epilogue (shift + ReLU).
            y = jnp.dot(a.astype(jnp.bfloat16), w,
                        preferred_element_type=jnp.float32)
            return jnp.maximum(y + shift(i), 0.0)

        out = stage(x_ref[...], w1[...], 0)            # block1
        out = stage(out, w2[...], 1)                   # block2
        out = stage(out, w3[...], 2) + out             # block3 + residual
        out = stage(out, w4[...], 3)                   # block4
        out = stage(out, w5[...], 4) + out             # block5 + residual
        out = stage(out, w6[...], 5)                   # block6
        out = stage(out, w7[...], 6) + out             # block7 + residual
        cp8.wait()
        out = stage(out, w8_buf[...], 7)               # block8
        cp9.wait()
        out = stage(out, w9_buf[...], 8) + out         # block9 + residual

        # block10: Linear(512, 1) as VPU multiply + lane reduce (an N=1 MXU
        # matmul would waste the array), then Softmax over dim=0 (batch axis).
        y = jnp.sum(out * w10_ref[...], axis=1, keepdims=True) + b10_ref[...]
        if batch_pad != batch_valid:                   # mask padded rows
            rows = jax.lax.broadcasted_iota(jnp.int32, (batch_pad, 1), 0)
            y = jnp.where(rows < batch_valid, y, -jnp.inf)
        m = jnp.max(y, axis=0, keepdims=True)
        e = jnp.exp(y - m)
        denom = jnp.sum(e, axis=0, keepdims=True)
        prob = e * pl.reciprocal(denom, approx=True)
        # Lane-dense store: broadcast across 128 lanes; slice outside.
        o_ref[...] = jnp.broadcast_to(prob, o_ref.shape)

    return kernel


def net_forward(x, params):
    ws, shift_slab, w10, b10 = params
    B, _ = x.shape
    pad_b = -(-B // 8) * 8                 # sublane-aligned batch
    if pad_b != B:
        x = jnp.pad(x, ((0, pad_b - B), (0, 0)))
    out_dims = tuple(int(w.shape[1]) for w in ws)

    # Advisory cost estimate for XLA's scheduler.
    weight_bytes = sum(w.size * w.dtype.itemsize for w in ws) + w10.size * 2
    bytes_accessed = int(weight_bytes + shift_slab.size * 4
                         + x.size * 4 + pad_b * 128 * 4)
    flops = int(2 * pad_b * (sum(int(w.shape[0]) * int(w.shape[1]) for w in ws)
                             + int(w10.size)))

    kernel = _make_kernel(pad_b, B, out_dims)
    flat = [x, *ws[:7], shift_slab, ws[7], ws[8], w10, b10]
    in_specs = [_VMEM] * 9 + [_ANY, _ANY, _VMEM, _VMEM]

    out = pl.pallas_call(
        kernel,
        out_shape=jax.ShapeDtypeStruct((pad_b, 128), jnp.float32),
        in_specs=in_specs,
        out_specs=_VMEM,
        scratch_shapes=[
            pltpu.VMEM(ws[7].shape, jnp.bfloat16),       # w8 buffer
            pltpu.VMEM(ws[8].shape, jnp.bfloat16),       # w9 buffer
            pltpu.SemaphoreType.DMA((2,)),
        ],
        cost_estimate=pl.CostEstimate(flops=flops,
                                      transcendentals=pad_b,
                                      bytes_accessed=bytes_accessed),
    )(*flat)
    return out[:B, :1]


net_forward_jit = jax.jit(net_forward)


# ---------------- parameter construction (deterministic, PyTorch-style init) -

def _init_linear(key, in_dim, out_dim):
    # torch.nn.Linear default init: U(-1/sqrt(in), 1/sqrt(in)).
    k_w, k_b = jax.random.split(key)
    bound = 1.0 / float(in_dim) ** 0.5
    w = jax.random.uniform(k_w, (in_dim, out_dim), jnp.float32, -bound, bound)
    b = jax.random.uniform(k_b, (out_dim,), jnp.float32, -bound, bound)
    return w, b


def make_net_params(input_size, seed=0):
    """Linear + BatchNorm1d (eval mode, fresh running stats) folded into
    bf16 weights and a lane-dense f32 shift slab; kernel computes
    relu(x @ W_folded + shift)."""
    n = 32
    dims = [
        (input_size, n),        # block1
        (n, n * 2),             # block2
        (n * 2, n * 2),         # block3
        (n * 2, n * 4),         # block4
        (n * 4, n * 4),         # block5
        (n * 4, n * 8),         # block6
        (n * 8, n * 8),         # block7
        (n * 8, n * 16),        # block8
        (n * 16, n * 16),       # block9
    ]
    keys = jax.random.split(jax.random.PRNGKey(seed), len(dims) + 1)
    ws = []
    shift_slab = jnp.zeros((_N_BLOCKS, _SHIFT_PAD), jnp.float32)
    for i, (d_in, d_out) in enumerate(dims):
        w, b = _init_linear(keys[i], d_in, d_out)
        gamma = jnp.ones((d_out,), jnp.float32)
        beta = jnp.zeros((d_out,), jnp.float32)
        running_mean = jnp.zeros((d_out,), jnp.float32)
        running_var = jnp.ones((d_out,), jnp.float32)
        bn_scale = gamma / jnp.sqrt(running_var + _BN_EPS)
        ws.append((w * bn_scale[None, :]).astype(jnp.bfloat16))
        shift = (b - running_mean) * bn_scale + beta
        shift_slab = shift_slab.at[i, :d_out].set(shift)
    w10, b10 = _init_linear(keys[-1], n * 16, 1)
    w10_row = w10.reshape(1, n * 16).astype(jnp.bfloat16)   # lane-dense (1,512)
    return ws, shift_slab, w10_row, b10.reshape(1, 1)


# ---------------- pure-JAX reference (same bf16 matmul path) ------------------

def _reference_forward(x, params):
    ws, shift_slab, w10, b10 = params
    dims = [int(w.shape[1]) for w in ws]

    def stage(a, i):
        y = jnp.dot(a.astype(jnp.bfloat16), ws[i],
                    preferred_element_type=jnp.float32)
        return jnp.maximum(y + shift_slab[i:i + 1, :dims[i]], 0.0)

    out = stage(x, 0)
    out = stage(out, 1)
    out = stage(out, 2) + out
    out = stage(out, 3)
    out = stage(out, 4) + out
    out = stage(out, 5)
    out = stage(out, 6) + out
    out = stage(out, 7)
    out = stage(out, 8) + out
    y = jnp.sum(out * w10.astype(jnp.float32), axis=1, keepdims=True) + b10
    return jax.nn.softmax(y, axis=0)


if __name__ == "__main__":
    INPUT_SIZE = 16
    BATCH = 8

    params = make_net_params(INPUT_SIZE, seed=0)
    x = jax.random.normal(jax.random.PRNGKey(0), (BATCH, INPUT_SIZE),
                          jnp.float32)

    out = jax.block_until_ready(net_forward_jit(x, params))

    assert out.shape == (BATCH, 1)
    # Softmax over dim=0 => column sums to 1 (loose tol: approx reciprocal).
    assert abs(float(jnp.sum(out)) - 1.0) < 1e-3

    ref = _reference_forward(x, params)
    assert bool(jnp.allclose(out, ref, rtol=5e-3, atol=5e-3))

    print("KERNEL_OK")
</pallas_src>

<mosaic_0001>
module attributes {stable_mosaic.version = 11 : i64} {
  func.func @kernel(%arg0: memref<8x16xf32, #tpu.memory_space<vmem>>, %arg1: memref<16x32xbf16, #tpu.memory_space<vmem>>, %arg2: memref<32x64xbf16, #tpu.memory_space<vmem>>, %arg3: memref<64x64xbf16, #tpu.memory_space<vmem>>, %arg4: memref<64x128xbf16, #tpu.memory_space<vmem>>, %arg5: memref<128x128xbf16, #tpu.memory_space<vmem>>, %arg6: memref<128x256xbf16, #tpu.memory_space<vmem>>, %arg7: memref<256x256xbf16, #tpu.memory_space<vmem>>, %arg8: memref<9x512xf32, #tpu.memory_space<vmem>>, %arg9: memref<256x512xbf16, #tpu.memory_space<any>>, %arg10: memref<512x512xbf16, #tpu.memory_space<any>>, %arg11: memref<1x512xbf16, #tpu.memory_space<vmem>>, %arg12: memref<1x1xf32, #tpu.memory_space<vmem>>, %arg13: memref<8x128xf32, #tpu.memory_space<vmem>>, %arg14: memref<256x512xbf16, #tpu.memory_space<vmem>>, %arg15: memref<512x512xbf16, #tpu.memory_space<vmem>>, %arg16: memref<2x!tpu.dma_semaphore, #tpu.memory_space<semaphore_mem>>) attributes {dimension_semantics = [], scalar_prefetch = 0 : i64, scratch_operands = 3 : i64, tpu.core_type = #tpu.core_type<tc>} {
    %c0_i32 = arith.constant 0 : i32
    %0 = tpu.memref_slice %arg16[%c0_i32] : memref<2x!tpu.dma_semaphore, #tpu.memory_space<semaphore_mem>> -> memref<1x!tpu.dma_semaphore, #tpu.memory_space<semaphore_mem>>
    %1 = tpu.memref_squeeze %0 : memref<1x!tpu.dma_semaphore, #tpu.memory_space<semaphore_mem>> -> memref<!tpu.dma_semaphore, #tpu.memory_space<semaphore_mem>>
    tpu.enqueue_dma source(%arg9 : memref<256x512xbf16, #tpu.memory_space<any>>) target(%arg14 : memref<256x512xbf16, #tpu.memory_space<vmem>>) target_semaphore(%1 : memref<!tpu.dma_semaphore, #tpu.memory_space<semaphore_mem>>)
    %c1_i32 = arith.constant 1 : i32
    %2 = tpu.memref_slice %arg16[%c1_i32] : memref<2x!tpu.dma_semaphore, #tpu.memory_space<semaphore_mem>> -> memref<1x!tpu.dma_semaphore, #tpu.memory_space<semaphore_mem>>
    %3 = tpu.memref_squeeze %2 : memref<1x!tpu.dma_semaphore, #tpu.memory_space<semaphore_mem>> -> memref<!tpu.dma_semaphore, #tpu.memory_space<semaphore_mem>>
    tpu.enqueue_dma source(%arg10 : memref<512x512xbf16, #tpu.memory_space<any>>) target(%arg15 : memref<512x512xbf16, #tpu.memory_space<vmem>>) target_semaphore(%3 : memref<!tpu.dma_semaphore, #tpu.memory_space<semaphore_mem>>)
    %c0 = arith.constant 0 : index
    %c0_0 = arith.constant 0 : index
    %4 = vector.load %arg0[%c0, %c0_0] : memref<8x16xf32, #tpu.memory_space<vmem>>, vector<8x16xf32>
    %c0_1 = arith.constant 0 : index
    %c0_2 = arith.constant 0 : index
    %5 = vector.load %arg1[%c0_1, %c0_2] : memref<16x32xbf16, #tpu.memory_space<vmem>>, vector<16x32xbf16>
    %6 = arith.truncf %4 : vector<8x16xf32> to vector<8x16xbf16>
    %cst = arith.constant dense<0.000000e+00> : vector<8x32xf32>
    %7 = tpu.matmul %6, %5, %cst {dimension_numbers = #tpu.dot_dimension_numbers<[1], [0], [0], [1], [0, 0, 1, 1], [], []>} : vector<8x16xbf16>, vector<16x32xbf16>, vector<8x32xf32> -> vector<8x32xf32>
    %c0_3 = arith.constant 0 : index
    %c0_4 = arith.constant 0 : index
    %8 = vector.load %arg8[%c0_3, %c0_4] : memref<9x512xf32, #tpu.memory_space<vmem>>, vector<1x512xf32>
    %9 = vector.extract_strided_slice %8 {offsets = [0, 0], sizes = [1, 32], strides = [1, 1]} : vector<1x512xf32> to vector<1x32xf32>
    %10 = vector.broadcast %9 : vector<1x32xf32> to vector<8x32xf32>
    %11 = arith.addf %7, %10 : vector<8x32xf32>
    %cst_5 = arith.constant 0.000000e+00 : f32
    %12 = vector.broadcast %cst_5 : f32 to vector<8x32xf32>
    %13 = arith.maximumf %11, %12 : vector<8x32xf32>
    %c0_6 = arith.constant 0 : index
    %c0_7 = arith.constant 0 : index
    %14 = vector.load %arg2[%c0_6, %c0_7] : memref<32x64xbf16, #tpu.memory_space<vmem>>, vector<32x64xbf16>
    %15 = arith.truncf %13 : vector<8x32xf32> to vector<8x32xbf16>
    %cst_8 = arith.constant dense<0.000000e+00> : vector<8x64xf32>
    %16 = tpu.matmul %15, %14, %cst_8 {dimension_numbers = #tpu.dot_dimension_numbers<[1], [0], [0], [1], [0, 0, 1, 1], [], []>} : vector<8x32xbf16>, vector<32x64xbf16>, vector<8x64xf32> -> vector<8x64xf32>
    %c1 = arith.constant 1 : index
    %c0_9 = arith.constant 0 : index
    %17 = vector.load %arg8[%c1, %c0_9] : memref<9x512xf32, #tpu.memory_space<vmem>>, vector<1x512xf32>
    %18 = vector.extract_strided_slice %17 {offsets = [0, 0], sizes = [1, 64], strides = [1, 1]} : vector<1x512xf32> to vector<1x64xf32>
    %19 = vector.broadcast %18 : vector<1x64xf32> to vector<8x64xf32>
    %20 = arith.addf %16, %19 : vector<8x64xf32>
    %cst_10 = arith.constant 0.000000e+00 : f32
    %21 = vector.broadcast %cst_10 : f32 to vector<8x64xf32>
    %22 = arith.maximumf %20, %21 : vector<8x64xf32>
    %c0_11 = arith.constant 0 : index
    %c0_12 = arith.constant 0 : index
    %23 = vector.load %arg3[%c0_11, %c0_12] : memref<64x64xbf16, #tpu.memory_space<vmem>>, vector<64x64xbf16>
    %24 = arith.truncf %22 : vector<8x64xf32> to vector<8x64xbf16>
    %cst_13 = arith.constant dense<0.000000e+00> : vector<8x64xf32>
    %25 = tpu.matmul %24, %23, %cst_13 {dimension_numbers = #tpu.dot_dimension_numbers<[1], [0], [0], [1], [0, 0, 1, 1], [], []>} : vector<8x64xbf16>, vector<64x64xbf16>, vector<8x64xf32> -> vector<8x64xf32>
    %c2 = arith.constant 2 : index
    %c0_14 = arith.constant 0 : index
    %26 = vector.load %arg8[%c2, %c0_14] : memref<9x512xf32, #tpu.memory_space<vmem>>, vector<1x512xf32>
    %27 = vector.extract_strided_slice %26 {offsets = [0, 0], sizes = [1, 64], strides = [1, 1]} : vector<1x512xf32> to vector<1x64xf32>
    %28 = vector.broadcast %27 : vector<1x64xf32> to vector<8x64xf32>
    %29 = arith.addf %25, %28 : vector<8x64xf32>
    %cst_15 = arith.constant 0.000000e+00 : f32
    %30 = vector.broadcast %cst_15 : f32 to vector<8x64xf32>
    %31 = arith.maximumf %29, %30 : vector<8x64xf32>
    %32 = arith.addf %31, %22 : vector<8x64xf32>
    %c0_16 = arith.constant 0 : index
    %c0_17 = arith.constant 0 : index
    %33 = vector.load %arg4[%c0_16, %c0_17] : memref<64x128xbf16, #tpu.memory_space<vmem>>, vector<64x128xbf16>
    %34 = arith.truncf %32 : vector<8x64xf32> to vector<8x64xbf16>
    %cst_18 = arith.constant dense<0.000000e+00> : vector<8x128xf32>
    %35 = tpu.matmul %34, %33, %cst_18 {dimension_numbers = #tpu.dot_dimension_numbers<[1], [0], [0], [1], [0, 0, 1, 1], [], []>} : vector<8x64xbf16>, vector<64x128xbf16>, vector<8x128xf32> -> vector<8x128xf32>
    %c3 = arith.constant 3 : index
    %c0_19 = arith.constant 0 : index
    %36 = vector.load %arg8[%c3, %c0_19] : memref<9x512xf32, #tpu.memory_space<vmem>>, vector<1x512xf32>
    %37 = vector.extract_strided_slice %36 {offsets = [0, 0], sizes = [1, 128], strides = [1, 1]} : vector<1x512xf32> to vector<1x128xf32>
    %38 = vector.broadcast %37 : vector<1x128xf32> to vector<8x128xf32>
    %39 = arith.addf %35, %38 : vector<8x128xf32>
    %cst_20 = arith.constant 0.000000e+00 : f32
    %40 = vector.broadcast %cst_20 : f32 to vector<8x128xf32>
    %41 = arith.maximumf %39, %40 : vector<8x128xf32>
    %c0_21 = arith.constant 0 : index
    %c0_22 = arith.constant 0 : index
    %42 = vector.load %arg5[%c0_21, %c0_22] : memref<128x128xbf16, #tpu.memory_space<vmem>>, vector<128x128xbf16>
    %43 = arith.truncf %41 : vector<8x128xf32> to vector<8x128xbf16>
    %cst_23 = arith.constant dense<0.000000e+00> : vector<8x128xf32>
    %44 = tpu.matmul %43, %42, %cst_23 {dimension_numbers = #tpu.dot_dimension_numbers<[1], [0], [0], [1], [0, 0, 1, 1], [], []>} : vector<8x128xbf16>, vector<128x128xbf16>, vector<8x128xf32> -> vector<8x128xf32>
    %c4 = arith.constant 4 : index
    %c0_24 = arith.constant 0 : index
    %45 = vector.load %arg8[%c4, %c0_24] : memref<9x512xf32, #tpu.memory_space<vmem>>, vector<1x512xf32>
    %46 = vector.extract_strided_slice %45 {offsets = [0, 0], sizes = [1, 128], strides = [1, 1]} : vector<1x512xf32> to vector<1x128xf32>
    %47 = vector.broadcast %46 : vector<1x128xf32> to vector<8x128xf32>
    %48 = arith.addf %44, %47 : vector<8x128xf32>
    %cst_25 = arith.constant 0.000000e+00 : f32
    %49 = vector.broadcast %cst_25 : f32 to vector<8x128xf32>
    %50 = arith.maximumf %48, %49 : vector<8x128xf32>
    %51 = arith.addf %50, %41 : vector<8x128xf32>
    %c0_26 = arith.constant 0 : index
    %c0_27 = arith.constant 0 : index
    %52 = vector.load %arg6[%c0_26, %c0_27] : memref<128x256xbf16, #tpu.memory_space<vmem>>, vector<128x256xbf16>
    %53 = arith.truncf %51 : vector<8x128xf32> to vector<8x128xbf16>
    %cst_28 = arith.constant dense<0.000000e+00> : vector<8x256xf32>
    %54 = tpu.matmul %53, %52, %cst_28 {dimension_numbers = #tpu.dot_dimension_numbers<[1], [0], [0], [1], [0, 0, 1, 1], [], []>} : vector<8x128xbf16>, vector<128x256xbf16>, vector<8x256xf32> -> vector<8x256xf32>
    %c5 = arith.constant 5 : index
    %c0_29 = arith.constant 0 : index
    %55 = vector.load %arg8[%c5, %c0_29] : memref<9x512xf32, #tpu.memory_space<vmem>>, vector<1x512xf32>
    %56 = vector.extract_strided_slice %55 {offsets = [0, 0], sizes = [1, 256], strides = [1, 1]} : vector<1x512xf32> to vector<1x256xf32>
    %57 = vector.broadcast %56 : vector<1x256xf32> to vector<8x256xf32>
    %58 = arith.addf %54, %57 : vector<8x256xf32>
    %cst_30 = arith.constant 0.000000e+00 : f32
    %59 = vector.broadcast %cst_30 : f32 to vector<8x256xf32>
    %60 = arith.maximumf %58, %59 : vector<8x256xf32>
    %c0_31 = arith.constant 0 : index
    %c0_32 = arith.constant 0 : index
    %61 = vector.load %arg7[%c0_31, %c0_32] : memref<256x256xbf16, #tpu.memory_space<vmem>>, vector<256x256xbf16>
    %62 = arith.truncf %60 : vector<8x256xf32> to vector<8x256xbf16>
    %cst_33 = arith.constant dense<0.000000e+00> : vector<8x256xf32>
    %63 = tpu.matmul %62, %61, %cst_33 {dimension_numbers = #tpu.dot_dimension_numbers<[1], [0], [0], [1], [0, 0, 1, 1], [], []>} : vector<8x256xbf16>, vector<256x256xbf16>, vector<8x256xf32> -> vector<8x256xf32>
    %c6 = arith.constant 6 : index
    %c0_34 = arith.constant 0 : index
    %64 = vector.load %arg8[%c6, %c0_34] : memref<9x512xf32, #tpu.memory_space<vmem>>, vector<1x512xf32>
    %65 = vector.extract_strided_slice %64 {offsets = [0, 0], sizes = [1, 256], strides = [1, 1]} : vector<1x512xf32> to vector<1x256xf32>
    %66 = vector.broadcast %65 : vector<1x256xf32> to vector<8x256xf32>
    %67 = arith.addf %63, %66 : vector<8x256xf32>
    %cst_35 = arith.constant 0.000000e+00 : f32
    %68 = vector.broadcast %cst_35 : f32 to vector<8x256xf32>
    %69 = arith.maximumf %67, %68 : vector<8x256xf32>
    %70 = arith.addf %69, %60 : vector<8x256xf32>
    %c0_i32_36 = arith.constant 0 : i32
    %71 = tpu.memref_slice %arg16[%c0_i32_36] : memref<2x!tpu.dma_semaphore, #tpu.memory_space<semaphore_mem>> -> memref<1x!tpu.dma_semaphore, #tpu.memory_space<semaphore_mem>>
    %72 = tpu.memref_squeeze %71 : memref<1x!tpu.dma_semaphore, #tpu.memory_space<semaphore_mem>> -> memref<!tpu.dma_semaphore, #tpu.memory_space<semaphore_mem>>
    tpu.wait_dma2 semaphore(%72 : memref<!tpu.dma_semaphore, #tpu.memory_space<semaphore_mem>>) src(%arg9 : memref<256x512xbf16, #tpu.memory_space<any>>) dst(%arg14 : memref<256x512xbf16, #tpu.memory_space<vmem>>)
    %c0_37 = arith.constant 0 : index
    %c0_38 = arith.constant 0 : index
    %73 = vector.load %arg14[%c0_37, %c0_38] : memref<256x512xbf16, #tpu.memory_space<vmem>>, vector<256x512xbf16>
    %74 = arith.truncf %70 : vector<8x256xf32> to vector<8x256xbf16>
    %cst_39 = arith.constant dense<0.000000e+00> : vector<8x512xf32>
    %75 = tpu.matmul %74, %73, %cst_39 {dimension_numbers = #tpu.dot_dimension_numbers<[1], [0], [0], [1], [0, 0, 1, 1], [], []>} : vector<8x256xbf16>, vector<256x512xbf16>, vector<8x512xf32> -> vector<8x512xf32>
    %c7 = arith.constant 7 : index
    %c0_40 = arith.constant 0 : index
    %76 = vector.load %arg8[%c7, %c0_40] : memref<9x512xf32, #tpu.memory_space<vmem>>, vector<1x512xf32>
    %77 = vector.broadcast %76 : vector<1x512xf32> to vector<8x512xf32>
    %78 = arith.addf %75, %77 : vector<8x512xf32>
    %cst_41 = arith.constant 0.000000e+00 : f32
    %79 = vector.broadcast %cst_41 : f32 to vector<8x512xf32>
    %80 = arith.maximumf %78, %79 : vector<8x512xf32>
    %c1_i32_42 = arith.constant 1 : i32
    %81 = tpu.memref_slice %arg16[%c1_i32_42] : memref<2x!tpu.dma_semaphore, #tpu.memory_space<semaphore_mem>> -> memref<1x!tpu.dma_semaphore, #tpu.memory_space<semaphore_mem>>
    %82 = tpu.memref_squeeze %81 : memref<1x!tpu.dma_semaphore, #tpu.memory_space<semaphore_mem>> -> memref<!tpu.dma_semaphore, #tpu.memory_space<semaphore_mem>>
    tpu.wait_dma2 semaphore(%82 : memref<!tpu.dma_semaphore, #tpu.memory_space<semaphore_mem>>) src(%arg10 : memref<512x512xbf16, #tpu.memory_space<any>>) dst(%arg15 : memref<512x512xbf16, #tpu.memory_space<vmem>>)
    %c0_43 = arith.constant 0 : index
    %c0_44 = arith.constant 0 : index
    %83 = vector.load %arg15[%c0_43, %c0_44] : memref<512x512xbf16, #tpu.memory_space<vmem>>, vector<512x512xbf16>
    %84 = arith.truncf %80 : vector<8x512xf32> to vector<8x512xbf16>
    %cst_45 = arith.constant dense<0.000000e+00> : vector<8x512xf32>
    %85 = tpu.matmul %84, %83, %cst_45 {dimension_numbers = #tpu.dot_dimension_numbers<[1], [0], [0], [1], [0, 0, 1, 1], [], []>} : vector<8x512xbf16>, vector<512x512xbf16>, vector<8x512xf32> -> vector<8x512xf32>
    %c8 = arith.constant 8 : index
    %c0_46 = arith.constant 0 : index
    %86 = vector.load %arg8[%c8, %c0_46] : memref<9x512xf32, #tpu.memory_space<vmem>>, vector<1x512xf32>
    %87 = vector.broadcast %86 : vector<1x512xf32> to vector<8x512xf32>
    %88 = arith.addf %85, %87 : vector<8x512xf32>
    %cst_47 = arith.constant 0.000000e+00 : f32
    %89 = vector.broadcast %cst_47 : f32 to vector<8x512xf32>
    %90 = arith.maximumf %88, %89 : vector<8x512xf32>
    %91 = arith.addf %90, %80 : vector<8x512xf32>
    %c0_48 = arith.constant 0 : index
    %c0_49 = arith.constant 0 : index
    %92 = vector.load %arg11[%c0_48, %c0_49] : memref<1x512xbf16, #tpu.memory_space<vmem>>, vector<1x512xbf16>
    %93 = arith.extf %92 : vector<1x512xbf16> to vector<1x512xf32>
    %94 = vector.broadcast %93 : vector<1x512xf32> to vector<8x512xf32>
    %95 = arith.mulf %91, %94 : vector<8x512xf32>
    %cst_50 = arith.constant dense<0.000000e+00> : vector<8xf32>
    %96 = vector.multi_reduction <add>, %95, %cst_50 [1] : vector<8x512xf32> to vector<8xf32>
    %97 = vector.shape_cast %96 : vector<8xf32> to vector<8x1xf32>
    %c0_51 = arith.constant 0 : index
    %c0_52 = arith.constant 0 : index
    %98 = vector.load %arg12[%c0_51, %c0_52] : memref<1x1xf32, #tpu.memory_space<vmem>>, vector<1x1xf32>
    %99 = vector.broadcast %98 : vector<1x1xf32> to vector<8x1xf32>
    %100 = arith.addf %97, %99 : vector<8x1xf32>
    %cst_53 = arith.constant dense<0xFF800000> : vector<1xf32>
    %101 = vector.multi_reduction <maximumf>, %100, %cst_53 [0] : vector<8x1xf32> to vector<1xf32>
    %102 = vector.shape_cast %101 : vector<1xf32> to vector<1x1xf32>
    %103 = vector.broadcast %102 : vector<1x1xf32> to vector<8x1xf32>
    %104 = arith.subf %100, %103 : vector<8x1xf32>
    %105 = math.exp %104 : vector<8x1xf32>
    %cst_54 = arith.constant dense<0.000000e+00> : vector<1xf32>
    %106 = vector.multi_reduction <add>, %105, %cst_54 [0] : vector<8x1xf32> to vector<1xf32>
    %107 = vector.shape_cast %106 : vector<1xf32> to vector<1x1xf32>
    %108 = tpu.reciprocal %107 {approx = true} : vector<1x1xf32> -> vector<1x1xf32>
    %109 = vector.broadcast %108 : vector<1x1xf32> to vector<8x1xf32>
    %110 = arith.mulf %105, %109 : vector<8x1xf32>
    %111 = vector.shape_cast %110 : vector<8x1xf32> to vector<8x1xf32>
    %112 = vector.broadcast %111 : vector<8x1xf32> to vector<8x128xf32>
    %c0_55 = arith.constant 0 : index
    %c0_56 = arith.constant 0 : index
    %113 = vector.load %arg13[%c0_55, %c0_56] : memref<8x128xf32, #tpu.memory_space<vmem>>, vector<8x128xf32>
    tpu.vector_store %arg13[%c0_55, %c0_56], %112 {strides = array<i32>} : memref<8x128xf32, #tpu.memory_space<vmem>>, vector<8x128xf32>,
    return
  }
}

</mosaic_0001>

<bundles_post_ra>
// kernel: net_forward.1
= control target key start
LH: loop header
LB: loop body
LE: loop exit
PB: predicated region body
PF: predicated region fallthrough
CT: control target
= control target key end

     0   :  { %s3840_s0 = inlined_call_operand.hbm [shape: f32[8,16], index: 0, kind: input, shape index: {}]   ;;  %s3841_s1 = inlined_call_operand.hbm [shape: bf16[16,32], index: 1, kind: input, shape index: {}]   ;;  %s3842_s2 = inlined_call_operand.hbm [shape: bf16[32,64], index: 2, kind: input, shape index: {}]   ;;  %s3843_s3 = inlined_call_operand.hbm [shape: bf16[64,64], index: 3, kind: input, shape index: {}]   ;;  %s3844_s4 = inlined_call_operand.hbm [shape: bf16[64,128], index: 4, kind: input, shape index: {}]   ;;  %s3845_s5 = inlined_call_operand.hbm [shape: bf16[128,128], index: 5, kind: input, shape index: {}]   ;;  %s3846_s6 = inlined_call_operand.hbm [shape: bf16[128,256], index: 6, kind: input, shape index: {}]   ;;  %s3847_s7 = inlined_call_operand.hbm [shape: bf16[256,256], index: 7, kind: input, shape index: {}]   ;;  %s3848_s8 = inlined_call_operand.hbm [shape: f32[9,512], index: 8, kind: input, shape index: {}]   ;;  %s3849_s9 = inlined_call_operand.hbm [shape: bf16[256,512], index: 9, kind: input, shape index: {}]   ;;  %s3850_s10 = inlined_call_operand.hbm [shape: bf16[512,512], index: 10, kind: input, shape index: {}]   ;;  %s3851_s11 = inlined_call_operand.vmem [shape: bf16[1,512], index: 11, kind: input, shape index: {}]   ;;  %s3852_s12 = inlined_call_operand.<no memory space> [shape: f32[1,1], index: 12, kind: input, shape index: {}]   ;;  %s3853_s13 = inlined_call_operand.vmem [shape: f32[8,128], index: 13, kind: output, shape index: {}]  }
   0x1   :  { %v18_v0 = vstv %s3852_s12 }
   0x2   :  { %19 = vst [vmem:[#allocation5] sm:$0x1] %v18_v0 }
   0x3   :  { %20 = vsyncpa [#allocation7], 0 }
   0x4   :  { %21 = vsyncpa [#allocation9], 0 }
   0x5   :  { %22 = vsyncpa [#allocation12], 0 }
   0x6   :  { %23 = vsyncpa [#allocation15], 0 }
   0x7   :  { %24 = vsyncpa [#allocation18], 0  ;;  %s3570_s27 = smov [#allocation8]  }
   0x8   :  { %s40_s28 = sshll.u32 %s3570_s27, 4  ;;  %s41_s28 = int_to_ptr.vmem [resolvable:$true] %s40_s28 }
   0x9   :  { %s3344_s29 = scalar_lea.vmem %s41_s28, 128  ;;  %p3349_p1 = scmp.lt.s32.totalorder %s41_s28, %s41_s28 }
   0xa   :  { %p3345_p0 = scmp.ne.s32.totalorder %s41_s28, %s3344_s29  ;;  %p3350_p2 = scmp.lt.s32.totalorder %s3344_s29, %s3344_s29 }
   0xc   :  { %p3351_p3 = por %p3350_p2, %p3349_p1 }
   0xe   :  { %p3352_p4 = pnand %p3351_p3, %p3345_p0 }
  0x10   :  { %3355 = shalt.err (!%p3352_p4)
}
  0x11   :  { %s3571_s30 = smov 64   ;;  %s3572_s14 = smov 4  }
  0x12   :  { %46 = dma.hbm_to_vmem [thread:$0]  %s3841_s1, 128, %s41_s28, [#allocation9], %s3571_s30, %s3571_s30, %s3572_s14  }
  0x13   :  { %s3573_s16 = smov [#allocation11]   ;;  %s3574_s18 = smov [#allocation14]  }
  0x14   :  { %s64_s17 = sshll.u32 %s3573_s16, 4  ;;  %s88_s19 = sshll.u32 %s3574_s18, 4  ;;  %s65_s17 = int_to_ptr.vmem [resolvable:$true] %s64_s17  ;;  %s89_s19 = int_to_ptr.vmem [resolvable:$true] %s88_s19 }
  0x15   :  { %s3364_s20 = scalar_lea.vmem %s65_s17, 512  ;;  %p3369_p6 = scmp.lt.s32.totalorder %s65_s17, %s65_s17 }
  0x16   :  { %p3365_p5 = scmp.ne.s32.totalorder %s65_s17, %s3364_s20  ;;  %p3370_p7 = scmp.lt.s32.totalorder %s3364_s20, %s3364_s20 }
  0x18   :  { %p3371_p8 = por %p3370_p7, %p3369_p6 }
  0x1a   :  { %p3372_p9 = pnand %p3371_p8, %p3365_p5 }
  0x1c   :  { %3375 = shalt.err (!%p3372_p9)
}
  0x1d   :  { %70 = dma.hbm_to_vmem [thread:$0]  %s3843_s3, 512, %s65_s17, [#allocation12], %s3571_s30, %s3571_s30, %s3572_s14  }
  0x1e   :  { %s3384_s1 = scalar_lea.vmem %s89_s19, 1024  ;;  %p3389_p11 = scmp.lt.s32.totalorder %s89_s19, %s89_s19 }
  0x1f   :  { %p3385_p10 = scmp.ne.s32.totalorder %s89_s19, %s3384_s1  ;;  %p3390_p12 = scmp.lt.s32.totalorder %s3384_s1, %s3384_s1 }
  0x21   :  { %p3391_p13 = por %p3390_p12, %p3389_p11 }
  0x23   :  { %p3392_p0 = pnand %p3391_p13, %p3385_p10 }
  0x25   :  { %3395 = shalt.err (!%p3392_p0)
}
  0x26   :  { %94 = dma.hbm_to_vmem [thread:$0]  %s3845_s5, 1024, %s89_s19, [#allocation15], %s3571_s30, %s3571_s30, %s3572_s14  }
  0x27   :  { %s3575_s25 = smov [#allocation17]   ;;  %s3576_s27 = smov [#allocation6]  }
  0x28   :  { %s112_s26 = sshll.u32 %s3575_s25, 4  ;;  %s31_s3 = sshll.u32 %s3576_s27, 4  ;;  %s113_s26 = int_to_ptr.vmem [resolvable:$true] %s112_s26  ;;  %s32_s3 = int_to_ptr.vmem [resolvable:$true] %s31_s3 }
  0x29   :  { %s3404_s28 = scalar_lea.vmem %s113_s26, 4096  ;;  %p3409_p2 = scmp.lt.s32.totalorder %s113_s26, %s113_s26 }
  0x2a   :  { %p3405_p1 = scmp.ne.s32.totalorder %s113_s26, %s3404_s28  ;;  %p3410_p3 = scmp.lt.s32.totalorder %s3404_s28, %s3404_s28 }
  0x2c   :  { %p3411_p4 = por %p3410_p3, %p3409_p2 }
  0x2e   :  { %p3412_p5 = pnand %p3411_p4, %p3405_p1 }
  0x30   :  { %3415 = shalt.err (!%p3412_p5)
}
  0x31   :  { %s3577_s29 = smov 128   ;;  %s3578_s12 = smov 8  }
  0x32   :  { %118 = dma.hbm_to_vmem [thread:$0]  %s3847_s7, 4096, %s113_s26, [#allocation18], %s3577_s29, %s3577_s29, %s3578_s12  }
  0x33   :  { %s3424_s5 = scalar_lea.vmem %s32_s3, 128  ;;  %p3429_p7 = scmp.lt.s32.totalorder %s32_s3, %s32_s3 }
  0x34   :  { %p3425_p6 = scmp.ne.s32.totalorder %s32_s3, %s3424_s5  ;;  %p3430_p8 = scmp.lt.s32.totalorder %s3424_s5, %s3424_s5 }
  0x36   :  { %p3431_p9 = por %p3430_p8, %p3429_p7 }
  0x38   :  { %p3432_p10 = pnand %p3431_p9, %p3425_p6 }
  0x3a   :  { %3435 = shalt.err (!%p3432_p10)
}
  0x3b   :  { %34 = dma.hbm_to_vmem [thread:$0]  %s3840_s0, 128, %s32_s3, [#allocation7]  }
  0x3c   :  { %s3579_s19 = smov [#allocation10]   ;;  %s3580_s21 = smov [#allocation13]  }
  0x3d   :  { %s52_s20 = sshll.u32 %s3579_s19, 4  ;;  %s76_s22 = sshll.u32 %s3580_s21, 4  ;;  %s53_s20 = int_to_ptr.vmem [resolvable:$true] %s52_s20  ;;  %s77_s22 = int_to_ptr.vmem [resolvable:$true] %s76_s22 }
  0x3e   :  { %s3444_s1 = scalar_lea.vmem %s53_s20, 256  ;;  %p3449_p12 = scmp.lt.s32.totalorder %s53_s20, %s53_s20 }
  0x3f   :  { %p3445_p11 = scmp.ne.s32.totalorder %s53_s20, %s3444_s1  ;;  %p3450_p13 = scmp.lt.s32.totalorder %s3444_s1, %s3444_s1 }
  0x41   :  { %p3451_p0 = por %p3450_p13, %p3449_p12 }
  0x43   :  { %p3452_p1 = pnand %p3451_p0, %p3445_p11 }
  0x45   :  { %3455 = shalt.err (!%p3452_p1)
}
  0x46   :  { %58 = dma.hbm_to_vmem [thread:$0]  %s3842_s2, 256, %s53_s20, [#allocation9], %s3571_s30, %s3571_s30, %s3572_s14  }
  0x47   :  { %s3464_s0 = scalar_lea.vmem %s77_s22, 512  ;;  %p3469_p3 = scmp.lt.s32.totalorder %s77_s22, %s77_s22 }
  0x48   :  { %p3465_p2 = scmp.ne.s32.totalorder %s77_s22, %s3464_s0  ;;  %p3470_p4 = scmp.lt.s32.totalorder %s3464_s0, %s3464_s0 }
  0x4a   :  { %p3471_p5 = por %p3470_p4, %p3469_p3 }
  0x4c   :  { %p3472_p6 = pnand %p3471_p5, %p3465_p2 }
  0x4e   :  { %3475 = shalt.err (!%p3472_p6)
}
  0x4f   :  { %82 = dma.hbm_to_vmem [thread:$0]  %s3844_s4, 512, %s77_s22, [#allocation12], %s3571_s30, %s3571_s30, %s3572_s14  }
  0x50   :  { %s3581_s26 = smov [#allocation16]   ;;  %s3582_s3 = smov [#allocation19]  }
  0x51   :  { %s100_s27 = sshll.u32 %s3581_s26, 4  ;;  %s124_s2 = sshll.u32 %s3582_s3, 4  ;;  %s101_s27 = int_to_ptr.vmem [resolvable:$true] %s100_s27  ;;  %s125_s2 = int_to_ptr.vmem [resolvable:$true] %s124_s2 }
  0x52   :  { %s3484_s28 = scalar_lea.vmem %s101_s27, 2048  ;;  %p3489_p8 = scmp.lt.s32.totalorder %s101_s27, %s101_s27 }
  0x53   :  { %p3485_p7 = scmp.ne.s32.totalorder %s101_s27, %s3484_s28  ;;  %p3490_p9 = scmp.lt.s32.totalorder %s3484_s28, %s3484_s28 }
  0x55   :  { %p3491_p10 = por %p3490_p9, %p3489_p8 }
  0x57   :  { %p3492_p11 = pnand %p3491_p10, %p3485_p7 }
  0x59   :  { %3495 = shalt.err (!%p3492_p11)
}
  0x5a   :  { %106 = dma.hbm_to_vmem [thread:$0]  %s3846_s6, 2048, %s101_s27, [#allocation15], %s3577_s29, %s3577_s29, %s3578_s12  }
  0x5b   :  { %s3504_s4 = scalar_lea.vmem %s125_s2, 1024  ;;  %p3509_p13 = scmp.lt.s32.totalorder %s125_s2, %s125_s2 }
  0x5c   :  { %p3505_p12 = scmp.ne.s32.totalorder %s125_s2, %s3504_s4  ;;  %p3510_p0 = scmp.lt.s32.totalorder %s3504_s4, %s3504_s4 }
  0x5e   :  { %p3511_p1 = por %p3510_p0, %p3509_p13 }
  0x60   :  { %p3512_p2 = pnand %p3511_p1, %p3505_p12 }
  0x62   :  { %3515 = shalt.err (!%p3512_p2)
}
  0x63   :  { %s3583_s30 = smov 512   ;;  %s3584_s14 = smov 32  }
  0x64   :  { %130 = dma.hbm_to_vmem [thread:$0]  %s3848_s8, 1024, %s125_s2, [#allocation18], %s3583_s30, %s3583_s30, %s3584_s14  }
  0x65   :  { %3556 = dma.done.wait [#allocation7], 128  }
  0x66   :  { %3557 = vsyncadd [#allocation7], 4294967168 }
  0x67   :  { %3558 = dma.done.wait [#allocation9], 384  }
  0x68   :  { %3559 = vsyncadd [#allocation9], 4294966912 }
  0x69   :  { %3560 = dma.done.wait [#allocation12], 1024  }
  0x6a   :  { %3561 = vsyncadd [#allocation12], 4294966272 }
  0x6b   :  { %3562 = dma.done.wait [#allocation15], 3072  }
  0x6c   :  { %3563 = vsyncadd [#allocation15], 4294964224 }
  0x6d   :  { %3564 = dma.done.wait [#allocation18], 5120  }
  0x6e   :  { %3565 = vsyncadd [#allocation18], 4294962176  ;;  %v3585_v1 = vmov 0.0   ;;  %vm3586_vm0 = vmmov 0   ;;  %v2952_v2 = vld [vmem:[#allocation8] sm:$0xff]   ;;  %v186_v3 = vld [vmem:[#allocation6] sm:$0xff]  ;;  %v192_v9 = vlaneseq }
  0x6f   :  { %2874 = vmatprep.subr.bf16.mxu0 %v3585_v1  ;;  %2876 = vmatprep.mubr.msk.bf16.mxu0 %vm3586_vm0, %v3585_v1  ;;  %vm203_vm1 = vcmask 130048   ;;  %v189_v4 = vpack.c.bf16 %v186_v3, %v186_v3  ;;  %v2953_v5 = vld [vmem:[#allocation10 + $0x8] sm:$0xff]   ;;  %v2954_v6 = vld [vmem:[#allocation10] sm:$0xff]   ;;  %vm273_vm2 = vcmask 261120   ;;  %v2957_v21 = vld [vmem:[#allocation11 + $0x8] sm:$0xff]   ;;  %vm359_vm3 = vcmask 523264  }
  0x70   :  { %2880 = vmatprep.subr.bf16.mxu1 %v3585_v1  ;;  %2884 = vmatprep.mubr.msk.bf16.mxu1 %vm3586_vm0, %v3585_v1  ;;  %v2955_v7 = vld [vmem:[#allocation11 + $0x18] sm:$0xff]   ;;  %v2956_v8 = vld [vmem:[#allocation11 + $0x10] sm:$0xff]   ;;  %v3724_v10 = vshrl.u32 %v192_v9, 7  ;;  %v2958_v22 = vld [vmem:[#allocation11] sm:$0xff]   ;;  %s3588_s6 = smov [#allocation2]   ;;  %s3589_s29 = smov [#allocation3]  }
  0x71   :  { %2875 = vmatpush3.bf16.msra.mxu0 %v2952_v2  ;;  %2881 = vmatpush3.bf16.msra.mxu1 %v2953_v5  ;;  %v190_v12 = vld [vmem:[#allocation19] ss:$8 sm:$0xf]  ;;  %v254_v25 = vld [vmem:[#allocation19 + $0x1] ss:$8 sm:$0xf] }
  0x72   :  { %2888 = vmatprep.subr.bf16.mxu0 %v3585_v1  ;;  %2882 = vmatprep.subr.bf16.mxu1 %v3585_v1  ;;  %v3727_v11 = vsub.s32 0, %v3724_v10  ;;  %v2959_v23 = vld [vmem:[#allocation13 + $0x18] sm:$0xff]   ;;  %v2960_v24 = vld [vmem:[#allocation13 + $0x10] sm:$0xff]   ;;  %v2961_v34 = vld [vmem:[#allocation13 + $0x8] sm:$0xff]   ;;  %s170_s8 = sshll.u32 %s3588_s6, 4  ;;  %s182_s12 = sshll.u32 %s3589_s29, 4  ;;  %s171_s8 = int_to_ptr.vmem [resolvable:$true] %s170_s8  ;;  %s183_s12 = int_to_ptr.vmem [resolvable:$true] %s182_s12 }
  0x73   :  { %v2962_v35 = vld [vmem:[#allocation13] sm:$0xff]   ;;  %v2963_v45 = vld [vmem:[#allocation14 + $0x38] sm:$0xff]   ;;  %v2964_v47 = vld [vmem:[#allocation14 + $0x30] sm:$0xff]   ;;  %s3524_s18 = scalar_lea.vmem %s171_s8, 8192  ;;  %p3529_p4 = scmp.lt.s32.totalorder %s171_s8, %s171_s8 }
  0x74   :  { %2877 = vmatmul.mubr.msk.bf16.vlgmr.msra.gmra.mxu0 %vm203_vm1, %v189_v4  ;;  %v195_v13 = vrot.slane %v190_v12, %v3727_v11  ;;  %v259_v26 = vrot.slane %v254_v25, %v3727_v11  ;;  %v328_v36 = vld [vmem:[#allocation19 + $0x2] ss:$8 sm:$0xf]  ;;  %v2973_v54 = vld [vmem:[#allocation16 + $0x74] ss:$8 sps:$4 sm:$0xff]   ;;  %p3525_p3 = scmp.ne.s32.totalorder %s171_s8, %s3524_s18  ;;  %p3530_p5 = scmp.lt.s32.totalorder %s3524_s18, %s3524_s18 }
  0x75   :  { %2896 = vmatprep.mubr.msk.bf16.mxu0 %vm3586_vm0, %v3585_v1  ;;  %2883 = vmatpush3.bf16.msra.mxu1 %v2954_v6  ;;  %v333_v37 = vrot.slane %v328_v36, %v3727_v11  ;;  %v2965_v48 = vld [vmem:[#allocation14 + $0x28] sm:$0xff]   ;;  %v2966_v49 = vld [vmem:[#allocation14 + $0x20] sm:$0xff]   ;;  %v2967_v50 = vld [vmem:[#allocation14 + $0x18] sm:$0xff]  }
  0x76   :  { %2900 = vmatprep.subr.bf16.mxu1 %v3585_v1  ;;  %2889 = vmatpush3.bf16.msra.mxu0 %v2955_v7  ;;  %v2968_v51 = vld [vmem:[#allocation14 + $0x10] sm:$0xff]   ;;  %v2969_v52 = vld [vmem:[#allocation14 + $0x8] sm:$0xff]   ;;  %v2970_v53 = vld [vmem:[#allocation14] sm:$0xff]   ;;  %p3531_p6 = por %p3530_p5, %p3529_p4 }
  0x77   :  { %2890 = vmatprep.subr.bf16.mxu0 %v3585_v1  ;;  %v415_v55 = vld [vmem:[#allocation19 + $0x3] ss:$8 sm:$0xf]  ;;  %v2976_v0 = vld [vmem:[#allocation16 + $0x64] ss:$8 sps:$4 sm:$0xff]  }
  0x78   :  { %v420_v56 = vrot.slane %v415_v55, %v3727_v11  ;;  %v2971_v62 = vld [vmem:[#allocation16 + $0x70] ss:$8 sps:$4 sm:$0xff]   ;;  %v2979_v3 = vld [vmem:[#allocation16 + $0x54] ss:$8 sps:$4 sm:$0xff]   ;;  %v2982_v5 = vld [vmem:[#allocation16 + $0x44] ss:$8 sps:$4 sm:$0xff]   ;;  %p3532_p7 = pnand %p3531_p6, %p3525_p3 }
  0x79   :  { %v2977_v4 = vld [vmem:[#allocation16 + $0x50] ss:$8 sps:$4 sm:$0xff]   ;;  %v2980_v6 = vld [vmem:[#allocation16 + $0x40] ss:$8 sps:$4 sm:$0xff]   ;;  %v2985_v7 = vld [vmem:[#allocation16 + $0x34] ss:$8 sps:$4 sm:$0xff]  }
  0x7a   :  { %2891 = vmatpush3.bf16.msra.mxu0 %v2956_v8  ;;  %v2983_v8 = vld [vmem:[#allocation16 + $0x30] ss:$8 sps:$4 sm:$0xff]   ;;  %v2988_v9 = vld [vmem:[#allocation16 + $0x24] ss:$8 sps:$4 sm:$0xff]   ;;  %v2986_v12 = vld [vmem:[#allocation16 + $0x20] ss:$8 sps:$4 sm:$0xff]  }
  0x7b   :  { %2892 = vmatprep.subr.bf16.mxu0 %v3585_v1  ;;  %v3004_v25 = vld [vmem:[#allocation17 + $0x40] ss:$8 sps:$4 sm:$0xff]   ;;  %v3024_v36 = vld [vmem:[#allocation17 + $0xe4] ss:$8 sps:$4 sm:$0xff]  }
  0x7e   :  { %2893 = vmatpush3.bf16.msra.mxu0 %v2957_v21  ;;  %v2998_v21 = vld [vmem:[#allocation17 + $0x60] ss:$8 sps:$4 sm:$0xff]  }
  0x7f   :  { %2894 = vmatprep.subr.bf16.mxu0 %v3585_v1 }
  0x82   :  { %2895 = vmatpush3.bf16.msra.mxu0 %v2958_v22  ;;  %v3003_v22 = vld [vmem:[#allocation17 + $0x54] ss:$8 sps:$4 sm:$0xff]  }
 0x134   :  { %v241_v14 = vpop.f32.mrf.mxu0 }
 0x135   :  { %v242_v15 = vadd.f32 %v241_v14, %v195_v13  ;;  %v2991_v13 = vld [vmem:[#allocation16 + $0x14] ss:$8 sps:$4 sm:$0xff]   ;;  %v2989_v14 = vld [vmem:[#allocation16 + $0x10] ss:$8 sps:$4 sm:$0xff]  }
 0x136   :  { %v2878_v16 = vpop.f32.mrf.mxu0 }
 0x137   :  { %v247_v17 = vmax.f32 %v242_v15, 0.0  ;;  %v2994_v15 = vld [vmem:[#allocation16 + $0x4] ss:$8 sps:$4 sm:$0xff]   ;;  %v2992_v16 = vld [vmem:[#allocation16] ss:$8 sps:$4 sm:$0xff]  }
 0x138   :  { %v244_v18 = vpop.f32.mrf.mxu0 }
 0x139   :  { %v252_v19 = vpack.c.bf16 %v247_v17, %v247_v17  ;;  %v3587_v17 = vmov 0   ;;  %v2995_v18 = vld [vmem:[#allocation17 + $0x70] ss:$8 sps:$4 sm:$0xff]  }
 0x13a   :  { %v2879_v20 = vpop.f32.mrf.mxu0 }
 0x13b   :  { %2885 = vmatmul.mubr.msk.bf16.vlgmr.msra.gmra.mxu1 %vm273_vm2, %v252_v19  ;;  %v2997_v19 = vld [vmem:[#allocation17 + $0x74] ss:$8 sps:$4 sm:$0xff]   ;;  %v3000_v20 = vld [vmem:[#allocation17 + $0x64] ss:$8 sps:$4 sm:$0xff]  }
 0x13c   :  { %2908 = vmatprep.mubr.msk.bf16.mxu1 %vm3586_vm0, %v3585_v1  ;;  %2901 = vmatpush3.bf16.msra.mxu1 %v2959_v23  ;;  %v3001_v23 = vld [vmem:[#allocation17 + $0x50] ss:$8 sps:$4 sm:$0xff]  }
 0x13d   :  { %2902 = vmatprep.subr.bf16.mxu1 %v3585_v1  ;;  %965 = vmatprep.subr.bf16.mxu0 %v2997_v19 }
 0x140   :  { %2903 = vmatpush3.bf16.msra.mxu1 %v2960_v24  ;;  %v3006_v24 = vld [vmem:[#allocation17 + $0x44] ss:$8 sps:$4 sm:$0xff]  }
 0x141   :  { %2904 = vmatprep.subr.bf16.mxu1 %v3585_v1 }
 0x144   :  { %2905 = vmatpush3.bf16.msra.mxu1 %v2961_v34  ;;  %v3021_v34 = vld [vmem:[#allocation17 + $0xf4] ss:$8 sps:$4 sm:$0xff]  }
 0x145   :  { %2906 = vmatprep.subr.bf16.mxu1 %v3585_v1 }
 0x148   :  { %2907 = vmatpush3.bf16.msra.mxu1 %v2962_v35  ;;  %v3019_v35 = vld [vmem:[#allocation17 + $0xf0] ss:$8 sps:$4 sm:$0xff]  }
 0x149   :  { %2912 = vmatprep.subr.bf16.mxu1 %v3585_v1 }
 0x1fb   :  { %v311_v27 = vpop.f32.mrf.mxu1 }
 0x1fc   :  { %v312_v28 = vadd.f32 %v311_v27, %v259_v26  ;;  %v3009_v26 = vld [vmem:[#allocation17 + $0x34] ss:$8 sps:$4 sm:$0xff]   ;;  %v3007_v27 = vld [vmem:[#allocation17 + $0x30] ss:$8 sps:$4 sm:$0xff]  }
 0x1fd   :  { %v2886_v29 = vpop.f32.mrf.mxu1 }
 0x1fe   :  { %v317_v30 = vmax.f32 %v312_v28, 0.0  ;;  %v3012_v28 = vld [vmem:[#allocation17 + $0x24] ss:$8 sps:$4 sm:$0xff]   ;;  %v3010_v29 = vld [vmem:[#allocation17 + $0x20] ss:$8 sps:$4 sm:$0xff]  }
 0x1ff   :  { %v314_v31 = vpop.f32.mrf.mxu1 }
 0x200   :  { %v326_v32 = vpack.c.bf16 %v317_v30, %v317_v30  ;;  %v3013_v31 = vld [vmem:[#allocation17 + $0x10] ss:$8 sps:$4 sm:$0xff]  }
 0x201   :  { %v2887_v33 = vpop.f32.mrf.mxu1 }
 0x202   :  { %2897 = vmatmul.mubr.msk.bf16.vlgmr.msra.gmra.mxu0 %vm359_vm3, %v326_v32  ;;  %v3018_v32 = vld [vmem:[#allocation17 + $0x4] ss:$8 sps:$4 sm:$0xff]   ;;  %v3016_v33 = vld [vmem:[#allocation17] ss:$8 sps:$4 sm:$0xff]  }
 0x203   :  { %966 = vmatpush1.bf16.msra.mxu0 %v2995_v18 }
 0x204   :  { %967 = vmatprep.subr.bf16.mxu0 %v3000_v20 }
 0x207   :  { %968 = vmatpush1.bf16.msra.mxu0 %v2998_v21 }
 0x208   :  { %969 = vmatprep.subr.bf16.mxu0 %v3003_v22 }
 0x20b   :  { %970 = vmatpush1.bf16.msra.mxu0 %v3001_v23 }
 0x20c   :  { %971 = vmatprep.subr.bf16.mxu0 %v3006_v24 }
 0x20f   :  { %972 = vmatpush1.bf16.msra.mxu0 %v3004_v25 }
 0x210   :  { %973 = vmatprep.subr.bf16.mxu0 %v3009_v26 }
 0x213   :  { %974 = vmatpush1.bf16.msra.mxu0 %v3007_v27 }
 0x214   :  { %975 = vmatprep.subr.bf16.mxu0 %v3012_v28 }
 0x217   :  { %976 = vmatpush1.bf16.msra.mxu0 %v3010_v29 }
 0x2c2   :  { %v397_v38 = vpop.f32.mrf.mxu0 }
 0x2c3   :  { %v398_v39 = vadd.f32 %v397_v38, %v333_v37  ;;  %v3022_v37 = vld [vmem:[#allocation17 + $0xe0] ss:$8 sps:$4 sm:$0xff]   ;;  %v3027_v38 = vld [vmem:[#allocation17 + $0xd4] ss:$8 sps:$4 sm:$0xff]  }
 0x2c4   :  { %v2898_v40 = vpop.f32.mrf.mxu0 }
 0x2c5   :  { %v403_v41 = vmax.f32 %v398_v39, 0.0  ;;  %v3025_v39 = vld [vmem:[#allocation17 + $0xd0] ss:$8 sps:$4 sm:$0xff]   ;;  %v3030_v40 = vld [vmem:[#allocation17 + $0xc4] ss:$8 sps:$4 sm:$0xff]  }
 0x2c6   :  { %v400_v42 = vpop.f32.mrf.mxu0 }
 0x2c7   :  { %v404_v43 = vadd.f32 %v403_v41, %v317_v30  ;;  %v3015_v30 = vld [vmem:[#allocation17 + $0x14] ss:$8 sps:$4 sm:$0xff]   ;;  %v3028_v41 = vld [vmem:[#allocation17 + $0xc0] ss:$8 sps:$4 sm:$0xff]  }
 0x2c8   :  { %v2899_v44 = vpop.f32.mrf.mxu0  ;;  %977 = vmatprep.subr.bf16.mxu0 %v3015_v30  ;;  %v3033_v42 = vld [vmem:[#allocation17 + $0xb4] ss:$8 sps:$4 sm:$0xff]  }
 0x2c9   :  { %v413_v46 = vpack.c.bf16 %v404_v43, %v404_v43  ;;  %978 = vmatpush1.bf16.msra.mxu0 %v3013_v31  ;;  %v3031_v43 = vld [vmem:[#allocation17 + $0xb0] ss:$8 sps:$4 sm:$0xff]   ;;  %v3036_v44 = vld [vmem:[#allocation17 + $0xa4] ss:$8 sps:$4 sm:$0xff]  }
 0x2ca   :  { %979 = vmatprep.subr.bf16.mxu0 %v3018_v32 }
 0x2cb   :  { %2909 = vmatmul.mubr.msk.bf16.vlgmr.msra.gmra.mxu1 %vm359_vm3, %v413_v46  ;;  %v508_v46 = vld [vmem:[#allocation19 + $0x4] ss:$8 sm:$0xf] }
 0x2cc   :  { %2913 = vmatpush3.bf16.msra.mxu1 %v2963_v45  ;;  %2928 = vmatprep.mubr.msk.bf16.mxu1 %vm3586_vm0, %v3585_v1  ;;  %v3034_v45 = vld [vmem:[#allocation17 + $0xa0] ss:$8 sps:$4 sm:$0xff]  }
 0x2cd   :  { %2914 = vmatprep.subr.bf16.mxu1 %v3585_v1  ;;  %980 = vmatpush1.bf16.msra.mxu0 %v3016_v33 }
 0x2ce   :  { %981 = vmatprep.subr.bf16.mxu0 %v3021_v34 }
 0x2d0   :  { %2915 = vmatpush3.bf16.msra.mxu1 %v2964_v47  ;;  %v513_v47 = vrot.slane %v508_v46, %v3727_v11 }
 0x2d1   :  { %2916 = vmatprep.subr.bf16.mxu1 %v3585_v1  ;;  %982 = vmatpush2.bf16.msra.mxu0 %v3019_v35 }
 0x2d2   :  { %983 = vmatprep.subr.bf16.mxu0 %v3024_v36 }
 0x2d4   :  { %2917 = vmatpush3.bf16.msra.mxu1 %v2965_v48 }
 0x2d5   :  { %2918 = vmatprep.subr.bf16.mxu1 %v3585_v1  ;;  %984 = vmatpush2.bf16.msra.mxu0 %v3022_v37 }
 0x2d6   :  { %985 = vmatprep.subr.bf16.mxu0 %v3027_v38 }
 0x2d8   :  { %2919 = vmatpush3.bf16.msra.mxu1 %v2966_v49 }
 0x2d9   :  { %2920 = vmatprep.subr.bf16.mxu1 %v3585_v1  ;;  %986 = vmatpush2.bf16.msra.mxu0 %v3025_v39 }
 0x2da   :  { %987 = vmatprep.subr.bf16.mxu0 %v3030_v40 }
 0x2dc   :  { %2921 = vmatpush3.bf16.msra.mxu1 %v2967_v50 }
 0x2dd   :  { %2922 = vmatprep.subr.bf16.mxu1 %v3585_v1  ;;  %988 = vmatpush2.bf16.msra.mxu0 %v3028_v41 }
 0x2de   :  { %989 = vmatprep.subr.bf16.mxu0 %v3033_v42 }
 0x2e0   :  { %2923 = vmatpush3.bf16.msra.mxu1 %v2968_v51 }
 0x2e1   :  { %2924 = vmatprep.subr.bf16.mxu1 %v3585_v1  ;;  %990 = vmatpush2.bf16.msra.mxu0 %v3031_v43 }
 0x2e2   :  { %991 = vmatprep.subr.bf16.mxu0 %v3036_v44 }
 0x2e4   :  { %2925 = vmatpush3.bf16.msra.mxu1 %v2969_v52 }
 0x2e5   :  { %2926 = vmatprep.subr.bf16.mxu1 %v3585_v1  ;;  %v2974_v1 = vld [vmem:[#allocation16 + $0x60] ss:$8 sps:$4 sm:$0xff]   ;;  %992 = vmatpush2.bf16.msra.mxu0 %v3034_v45 }
 0x2e8   :  { %2927 = vmatpush3.bf16.msra.mxu1 %v2970_v53 }
 0x2e9   :  { %715 = vmatprep.subr.bf16.mxu1 %v2973_v54 }
 0x38b   :  { %v483_v57 = vpop.f32.mrf.mxu1 }
 0x38c   :  { %v484_v58 = vadd.f32 %v483_v57, %v420_v56  ;;  %v3039_v56 = vld [vmem:[#allocation17 + $0x94] ss:$8 sps:$4 sm:$0xff]   ;;  %v3037_v57 = vld [vmem:[#allocation17 + $0x90] ss:$8 sps:$4 sm:$0xff]  }
 0x38d   :  { %v2910_v59 = vpop.f32.mrf.mxu1  ;;  %993 = vmatprep.subr.bf16.mxu0 %v3039_v56 }
 0x38e   :  { %v3751_v60 = vmax.f32 %v484_v58, 0.0  ;;  %994 = vmatpush2.bf16.msra.mxu0 %v3037_v57  ;;  %v3042_v58 = vld [vmem:[#allocation17 + $0x84] ss:$8 sps:$4 sm:$0xff]   ;;  %v3040_v59 = vld [vmem:[#allocation17 + $0x80] ss:$8 sps:$4 sm:$0xff]  }
 0x38f   :  { %v486_v61 = vpop.f32.mrf.mxu1  ;;  %995 = vmatprep.subr.bf16.mxu0 %v3042_v58 }
 0x390   :  { %v506_v63 = vpack.c.bf16 %v3751_v60, %v3751_v60  ;;  %v623_v61 = vld [vmem:[#allocation19 + $0x5] ss:$8 sm:$0xf] }
 0x391   :  { %v2911_v2 = vpop.f32.mrf.mxu1 }
 0x392   :  { %2929 = vmatmul.mubr.bf16.vlgmr.msra.gmra.mxu1 %v506_v63  ;;  %996 = vmatpush2.bf16.msra.mxu0 %v3040_v59  ;;  %v628_v63 = vrot.slane %v623_v61, %v3727_v11 }
 0x393   :  { %716 = vmatpush1.bf16.msra.mxu1 %v2971_v62  ;;  %747 = vmatprep.mubr.bf16.mxu1 %v3587_v17  ;;  %v3759_v62 = vsub.s32 1, %v3724_v10 }
 0x394   :  { %717 = vmatprep.subr.bf16.mxu1 %v2976_v0 }
 0x395   :  { %v632_v0 = vrot.slane %v623_v61, %v3759_v62 }
 0x397   :  { %718 = vmatpush1.bf16.msra.mxu1 %v2974_v1 }
 0x398   :  { %719 = vmatprep.subr.bf16.mxu1 %v2979_v3 }
 0x39b   :  { %720 = vmatpush1.bf16.msra.mxu1 %v2977_v4 }
 0x39c   :  { %721 = vmatprep.subr.bf16.mxu1 %v2982_v5 }
 0x39f   :  { %722 = vmatpush1.bf16.msra.mxu1 %v2980_v6 }
 0x3a0   :  { %723 = vmatprep.subr.bf16.mxu1 %v2985_v7 }
 0x3a3   :  { %724 = vmatpush1.bf16.msra.mxu1 %v2983_v8 }
 0x3a4   :  { %725 = vmatprep.subr.bf16.mxu1 %v2988_v9 }
 0x3a7   :  { %726 = vmatpush1.bf16.msra.mxu1 %v2986_v12 }
 0x3a8   :  { %727 = vmatprep.subr.bf16.mxu1 %v2991_v13 }
 0x3ab   :  { %728 = vmatpush1.bf16.msra.mxu1 %v2989_v14 }
 0x3ac   :  { %729 = vmatprep.subr.bf16.mxu1 %v2994_v15 }
 0x3af   :  { %730 = vmatpush1.bf16.msra.mxu1 %v2992_v16 }
 0x452   :  { %v597_v48 = vpop.f32.mrf.mxu1 }
 0x453   :  { %v598_v49 = vadd.f32 %v597_v48, %v513_v47 }
 0x454   :  { %v2930_v50 = vpop.f32.mrf.mxu1 }
 0x455   :  { %v603_v51 = vmax.f32 %v598_v49, 0.0 }
 0x456   :  { %v600_v52 = vpop.f32.mrf.mxu1 }
 0x457   :  { %v604_v53 = vadd.f32 %v603_v51, %v3751_v60 }
 0x458   :  { %v2931_v54 = vpop.f32.mrf.mxu1 }
 0x459   :  { %v621_v55 = vpack.c.bf16 %v604_v53, %v604_v53 }
 0x45b   :  { %748 = vmatmul.mubr.bf16.vlgmr.msra.gmra.mxu1 %v621_v55 }
 0x51b   :  { %v749_v60 = vpop.f32.mrf.mxu1 }
 0x51c   :  { %v750_v2 = vadd.f32 %v749_v60, %v628_v63 }
 0x51d   :  { %v751_v1 = vpop.f32.mrf.mxu1 }
 0x51e   :  { %v752_v3 = vadd.f32 %v751_v1, %v632_v0  ;;  %v756_v4 = vmax.f32 %v750_v2, 0.0 }
 0x51f   :  { %v753_v5 = vpop.f32.mrf.mxu1 }
 0x520   :  { %v757_v6 = vmax.f32 %v752_v3, 0.0  ;;  %v790_v9 = vpack.c.bf16 %v756_v4, %v756_v4 }
 0x521   :  { %v754_v7 = vpop.f32.mrf.mxu1 }
 0x522   :  { %v791_v8 = vpack.c.bf16 %v757_v6, %v757_v6 }
 0x524   :  { %997 = vmatprep.mubr.bf16.mxu0 %v791_v8 }
 0x525   :  { %998 = vmatmul.mubr.bf16.vlgmr.msra.gmra.mxu0 %v790_v9 }
 0x526   :  { %3535 = shalt.err (!%p3532_p7)  }
 0x527   :  { %173 = dma.hbm_to_vmem [thread:$0]  %s3849_s9, 8192, %s171_s8, [#allocation4] }
 0x528   :  { %s3544_s21 = scalar_lea.vmem %s183_s12, 16384  ;;  %p3549_p9 = scmp.lt.s32.totalorder %s183_s12, %s183_s12 }
 0x529   :  { %p3545_p8 = scmp.ne.s32.totalorder %s183_s12, %s3544_s21  ;;  %p3550_p10 = scmp.lt.s32.totalorder %s3544_s21, %s3544_s21 }
 0x52b   :  { %p3551_p11 = por %p3550_p10, %p3549_p9 }
 0x52d   :  { %p3552_p12 = pnand %p3551_p11, %p3545_p8 }
 0x52f   :  { %3555 = shalt.err (!%p3552_p12)  }
 0x530   :  { %185 = dma.hbm_to_vmem [thread:$0]  %s3850_s10, 16384, %s183_s12, [#allocation4 + $0x1]  ;;  %v793_v12 = vld [vmem:[#allocation19 + $0x6] ss:$8 sm:$0xf] }
 0x531   :  { %v798_v13 = vrot.slane %v793_v12, %v3727_v11  ;;  %v802_v14 = vrot.slane %v793_v12, %v3759_v62 }
 0x5e5   :  { %v999_v15 = vpop.f32.mrf.mxu0 }
 0x5e6   :  { %v1000_v16 = vadd.f32 %v999_v15, %v798_v13 }
 0x5e7   :  { %v1001_v18 = vpop.f32.mrf.mxu0 }
 0x5e8   :  { %v1006_v19 = vmax.f32 %v1000_v16, 0.0  ;;  %v1002_v20 = vadd.f32 %v1001_v18, %v802_v14 }
 0x5e9   :  { %v1003_v21 = vpop.f32.mrf.mxu0 }
 0x5ea   :  { %v3771_v22 = vadd.f32 %v1006_v19, %v756_v4  ;;  %v1007_v23 = vmax.f32 %v1002_v20, 0.0 }
 0x5eb   :  { %v1004_v24 = vpop.f32.mrf.mxu0 }
 0x5ec   :  { %v1009_v25 = vadd.f32 %v1007_v23, %v757_v6 }
 0x5ed   :  { %3566 = dma.done.wait [#allocation4], 8192 }
 0x5ee   :  { %3567 = vsyncadd [#allocation4], 4294959104  ;;  %v1079_v26 = vpack.c.bf16 %v1009_v25, %v1009_v25  ;;  %v3043_v27 = vld [vmem:[#allocation2 + $0xe4] ss:$16 sps:$4 sm:$0xff]   ;;  %v3045_v28 = vld [vmem:[#allocation2 + $0xec] ss:$16 sps:$4 sm:$0xff]  }
 0x5ef   :  { %1423 = vmatprep.subr.bf16.mxu1 %v3043_v27  ;;  %v3047_v29 = vld [vmem:[#allocation2 + $0xe0] ss:$16 sps:$4 sm:$0xff]   ;;  %v3048_v30 = vld [vmem:[#allocation2 + $0xe8] ss:$16 sps:$4 sm:$0xff]   ;;  %1464 = vmatprep.subr.bf16.mxu0 %v3045_v28  ;;  %v3049_v31 = vld [vmem:[#allocation2 + $0xc4] ss:$16 sps:$4 sm:$0xff]  }
 0x5f0   :  { %1455 = vmatprep.mubr.bf16.mxu1 %v1079_v26  ;;  %1496 = vmatprep.mubr.bf16.mxu0 %v1079_v26  ;;  %v3051_v32 = vld [vmem:[#allocation2 + $0xcc] ss:$16 sps:$4 sm:$0xff]   ;;  %v3053_v33 = vld [vmem:[#allocation2 + $0xc0] ss:$16 sps:$4 sm:$0xff]   ;;  %v3054_v34 = vld [vmem:[#allocation2 + $0xc8] ss:$16 sps:$4 sm:$0xff]  }
 0x5f1   :  { %1424 = vmatpush1.bf16.msra.mxu1 %v3047_v29  ;;  %1465 = vmatpush1.bf16.msra.mxu0 %v3048_v30  ;;  %v3055_v35 = vld [vmem:[#allocation2 + $0xa4] ss:$16 sps:$4 sm:$0xff]   ;;  %v3057_v36 = vld [vmem:[#allocation2 + $0xac] ss:$16 sps:$4 sm:$0xff]   ;;  %v3059_v37 = vld [vmem:[#allocation2 + $0xa0] ss:$16 sps:$4 sm:$0xff]  }
 0x5f2   :  { %1425 = vmatprep.subr.bf16.mxu1 %v3049_v31  ;;  %1466 = vmatprep.subr.bf16.mxu0 %v3051_v32  ;;  %v3060_v38 = vld [vmem:[#allocation2 + $0xa8] ss:$16 sps:$4 sm:$0xff]   ;;  %v3061_v39 = vld [vmem:[#allocation2 + $0x84] ss:$16 sps:$4 sm:$0xff]   ;;  %v3063_v40 = vld [vmem:[#allocation2 + $0x8c] ss:$16 sps:$4 sm:$0xff]   ;;  %v1078_v32 = vpack.c.bf16 %v3771_v22, %v3771_v22 }
 0x5f3   :  { %v3065_v41 = vld [vmem:[#allocation2 + $0x80] ss:$16 sps:$4 sm:$0xff]   ;;  %v3066_v42 = vld [vmem:[#allocation2 + $0x88] ss:$16 sps:$4 sm:$0xff]   ;;  %v3067_v43 = vld [vmem:[#allocation2 + $0x64] ss:$16 sps:$4 sm:$0xff]  }
 0x5f4   :  { %v3069_v44 = vld [vmem:[#allocation2 + $0x6c] ss:$16 sps:$4 sm:$0xff]   ;;  %v3071_v45 = vld [vmem:[#allocation2 + $0x60] ss:$16 sps:$4 sm:$0xff]   ;;  %v3072_v46 = vld [vmem:[#allocation2 + $0x68] ss:$16 sps:$4 sm:$0xff]  }
 0x5f5   :  { %1426 = vmatpush1.bf16.msra.mxu1 %v3053_v33  ;;  %1467 = vmatpush1.bf16.msra.mxu0 %v3054_v34  ;;  %v3073_v47 = vld [vmem:[#allocation2 + $0x44] ss:$16 sps:$4 sm:$0xff]   ;;  %v3075_v48 = vld [vmem:[#allocation2 + $0x4c] ss:$16 sps:$4 sm:$0xff]   ;;  %v3077_v49 = vld [vmem:[#allocation2 + $0x40] ss:$16 sps:$4 sm:$0xff]  }
 0x5f6   :  { %1427 = vmatprep.subr.bf16.mxu1 %v3055_v35  ;;  %1468 = vmatprep.subr.bf16.mxu0 %v3057_v36  ;;  %v3078_v50 = vld [vmem:[#allocation2 + $0x48] ss:$16 sps:$4 sm:$0xff]   ;;  %v3079_v51 = vld [vmem:[#allocation2 + $0x24] ss:$16 sps:$4 sm:$0xff]   ;;  %v3081_v52 = vld [vmem:[#allocation2 + $0x2c] ss:$16 sps:$4 sm:$0xff]  }
 0x5f7   :  { %v3083_v53 = vld [vmem:[#allocation2 + $0x20] ss:$16 sps:$4 sm:$0xff]   ;;  %v3084_v54 = vld [vmem:[#allocation2 + $0x28] ss:$16 sps:$4 sm:$0xff]   ;;  %v3085_v55 = vld [vmem:[#allocation2 + $0x4] ss:$16 sps:$4 sm:$0xff]  }
 0x5f8   :  { %v3087_v56 = vld [vmem:[#allocation2 + $0xc] ss:$16 sps:$4 sm:$0xff]   ;;  %v3089_v57 = vld [vmem:[#allocation2] ss:$16 sps:$4 sm:$0xff]   ;;  %v3090_v58 = vld [vmem:[#allocation2 + $0x8] ss:$16 sps:$4 sm:$0xff]  }
 0x5f9   :  { %1428 = vmatpush1.bf16.msra.mxu1 %v3059_v37  ;;  %1469 = vmatpush1.bf16.msra.mxu0 %v3060_v38  ;;  %v3091_v59 = vld [vmem:[#allocation2 + $0x1e4] ss:$16 sps:$4 sm:$0xff]   ;;  %v3093_v61 = vld [vmem:[#allocation2 + $0x1ec] ss:$16 sps:$4 sm:$0xff]   ;;  %v3095_v63 = vld [vmem:[#allocation2 + $0x1e0] ss:$16 sps:$4 sm:$0xff]  }
 0x5fa   :  { %1429 = vmatprep.subr.bf16.mxu1 %v3061_v39  ;;  %1470 = vmatprep.subr.bf16.mxu0 %v3063_v40  ;;  %v3096_v0 = vld [vmem:[#allocation2 + $0x1e8] ss:$16 sps:$4 sm:$0xff]   ;;  %v3097_v60 = vld [vmem:[#allocation2 + $0x1c4] ss:$16 sps:$4 sm:$0xff]   ;;  %v3099_v2 = vld [vmem:[#allocation2 + $0x1cc] ss:$16 sps:$4 sm:$0xff]  }
 0x5fb   :  { %v3101_v1 = vld [vmem:[#allocation2 + $0x1c0] ss:$16 sps:$4 sm:$0xff]   ;;  %v3102_v3 = vld [vmem:[#allocation2 + $0x1c8] ss:$16 sps:$4 sm:$0xff]   ;;  %v3103_v4 = vld [vmem:[#allocation2 + $0x1a4] ss:$16 sps:$4 sm:$0xff]  }
 0x5fc   :  { %v3105_v5 = vld [vmem:[#allocation2 + $0x1ac] ss:$16 sps:$4 sm:$0xff]   ;;  %v3107_v6 = vld [vmem:[#allocation2 + $0x1a0] ss:$16 sps:$4 sm:$0xff]   ;;  %v3108_v7 = vld [vmem:[#allocation2 + $0x1a8] ss:$16 sps:$4 sm:$0xff]  }
 0x5fd   :  { %1430 = vmatpush1.bf16.msra.mxu1 %v3065_v41  ;;  %1471 = vmatpush1.bf16.msra.mxu0 %v3066_v42  ;;  %v3109_v8 = vld [vmem:[#allocation2 + $0x184] ss:$16 sps:$4 sm:$0xff]   ;;  %v3111_v9 = vld [vmem:[#allocation2 + $0x18c] ss:$16 sps:$4 sm:$0xff]   ;;  %v3113_v12 = vld [vmem:[#allocation2 + $0x180] ss:$16 sps:$4 sm:$0xff]  }
 0x5fe   :  { %1431 = vmatprep.subr.bf16.mxu1 %v3067_v43  ;;  %1472 = vmatprep.subr.bf16.mxu0 %v3069_v44  ;;  %v3114_v13 = vld [vmem:[#allocation2 + $0x188] ss:$16 sps:$4 sm:$0xff]   ;;  %v3115_v14 = vld [vmem:[#allocation2 + $0x164] ss:$16 sps:$4 sm:$0xff]   ;;  %v3117_v15 = vld [vmem:[#allocation2 + $0x16c] ss:$16 sps:$4 sm:$0xff]  }
 0x5ff   :  { %v3119_v16 = vld [vmem:[#allocation2 + $0x160] ss:$16 sps:$4 sm:$0xff]   ;;  %v3120_v18 = vld [vmem:[#allocation2 + $0x168] ss:$16 sps:$4 sm:$0xff]   ;;  %v3121_v19 = vld [vmem:[#allocation2 + $0x144] ss:$16 sps:$4 sm:$0xff]  }
 0x600   :  { %v3123_v20 = vld [vmem:[#allocation2 + $0x14c] ss:$16 sps:$4 sm:$0xff]   ;;  %v3125_v21 = vld [vmem:[#allocation2 + $0x140] ss:$16 sps:$4 sm:$0xff]   ;;  %v3126_v23 = vld [vmem:[#allocation2 + $0x148] ss:$16 sps:$4 sm:$0xff]  }
 0x601   :  { %1432 = vmatpush1.bf16.msra.mxu1 %v3071_v45  ;;  %1473 = vmatpush1.bf16.msra.mxu0 %v3072_v46  ;;  %v3127_v24 = vld [vmem:[#allocation2 + $0x124] ss:$16 sps:$4 sm:$0xff]   ;;  %v3129_v25 = vld [vmem:[#allocation2 + $0x12c] ss:$16 sps:$4 sm:$0xff]   ;;  %v3131_v26 = vld [vmem:[#allocation2 + $0x120] ss:$16 sps:$4 sm:$0xff]  }
 0x602   :  { %1433 = vmatprep.subr.bf16.mxu1 %v3073_v47  ;;  %1474 = vmatprep.subr.bf16.mxu0 %v3075_v48  ;;  %v3132_v27 = vld [vmem:[#allocation2 + $0x128] ss:$16 sps:$4 sm:$0xff]   ;;  %v3133_v28 = vld [vmem:[#allocation2 + $0x104] ss:$16 sps:$4 sm:$0xff]   ;;  %v3135_v29 = vld [vmem:[#allocation2 + $0x10c] ss:$16 sps:$4 sm:$0xff]  }
 0x603   :  { %v3137_v30 = vld [vmem:[#allocation2 + $0x100] ss:$16 sps:$4 sm:$0xff]   ;;  %v3138_v31 = vld [vmem:[#allocation2 + $0x108] ss:$16 sps:$4 sm:$0xff]   ;;  %v3776_v33 = vsub.s32 2, %v3724_v10  ;;  %v1097_v35 = vsub.s32 3, %v3724_v10 }
 0x604   :  { %v1081_v34 = vld [vmem:[#allocation19 + $0x7] ss:$8 sm:$0xf] }
 0x605   :  { %1434 = vmatpush1.bf16.msra.mxu1 %v3077_v49  ;;  %1475 = vmatpush1.bf16.msra.mxu0 %v3078_v50  ;;  %v1086_v36 = vrot.slane %v1081_v34, %v3727_v11  ;;  %v1094_v37 = vrot.slane %v1081_v34, %v3776_v33  ;;  %v1090_v38 = vrot.slane %v1081_v34, %v3759_v62 }
 0x606   :  { %1435 = vmatprep.subr.bf16.mxu1 %v3079_v51  ;;  %1476 = vmatprep.subr.bf16.mxu0 %v3081_v52  ;;  %v1098_v39 = vrot.slane %v1081_v34, %v1097_v35 }
 0x609   :  { %1436 = vmatpush1.bf16.msra.mxu1 %v3083_v53  ;;  %1477 = vmatpush1.bf16.msra.mxu0 %v3084_v54 }
 0x60a   :  { %1437 = vmatprep.subr.bf16.mxu1 %v3085_v55  ;;  %1478 = vmatprep.subr.bf16.mxu0 %v3087_v56 }
 0x60d   :  { %1438 = vmatpush1.bf16.msra.mxu1 %v3089_v57  ;;  %1479 = vmatpush1.bf16.msra.mxu0 %v3090_v58 }
 0x60e   :  { %1439 = vmatprep.subr.bf16.mxu1 %v3091_v59  ;;  %1480 = vmatprep.subr.bf16.mxu0 %v3093_v61 }
 0x611   :  { %1440 = vmatpush2.bf16.msra.mxu1 %v3095_v63  ;;  %1481 = vmatpush2.bf16.msra.mxu0 %v3096_v0 }
 0x612   :  { %1441 = vmatprep.subr.bf16.mxu1 %v3097_v60  ;;  %1482 = vmatprep.subr.bf16.mxu0 %v3099_v2 }
 0x615   :  { %1442 = vmatpush2.bf16.msra.mxu1 %v3101_v1  ;;  %1483 = vmatpush2.bf16.msra.mxu0 %v3102_v3 }
 0x616   :  { %1443 = vmatprep.subr.bf16.mxu1 %v3103_v4  ;;  %1484 = vmatprep.subr.bf16.mxu0 %v3105_v5 }
 0x619   :  { %1444 = vmatpush2.bf16.msra.mxu1 %v3107_v6  ;;  %1485 = vmatpush2.bf16.msra.mxu0 %v3108_v7 }
 0x61a   :  { %1445 = vmatprep.subr.bf16.mxu1 %v3109_v8  ;;  %1486 = vmatprep.subr.bf16.mxu0 %v3111_v9 }
 0x61d   :  { %1446 = vmatpush2.bf16.msra.mxu1 %v3113_v12  ;;  %1487 = vmatpush2.bf16.msra.mxu0 %v3114_v13 }
 0x61e   :  { %1447 = vmatprep.subr.bf16.mxu1 %v3115_v14  ;;  %1488 = vmatprep.subr.bf16.mxu0 %v3117_v15 }
 0x621   :  { %1448 = vmatpush2.bf16.msra.mxu1 %v3119_v16  ;;  %1489 = vmatpush2.bf16.msra.mxu0 %v3120_v18 }
 0x622   :  { %1449 = vmatprep.subr.bf16.mxu1 %v3121_v19  ;;  %1490 = vmatprep.subr.bf16.mxu0 %v3123_v20 }
 0x625   :  { %1450 = vmatpush2.bf16.msra.mxu1 %v3125_v21  ;;  %1491 = vmatpush2.bf16.msra.mxu0 %v3126_v23 }
 0x626   :  { %1451 = vmatprep.subr.bf16.mxu1 %v3127_v24  ;;  %1492 = vmatprep.subr.bf16.mxu0 %v3129_v25 }
 0x629   :  { %1452 = vmatpush2.bf16.msra.mxu1 %v3131_v26  ;;  %1493 = vmatpush2.bf16.msra.mxu0 %v3132_v27 }
 0x62a   :  { %1453 = vmatprep.subr.bf16.mxu1 %v3133_v28  ;;  %1494 = vmatprep.subr.bf16.mxu0 %v3135_v29 }
 0x62d   :  { %1454 = vmatpush2.bf16.msra.mxu1 %v3137_v30  ;;  %1495 = vmatpush2.bf16.msra.mxu0 %v3138_v31 }
 0x630   :  { %1456 = vmatmul.mubr.bf16.vlgmr.msra.gmra.mxu1 %v1078_v32  ;;  %1497 = vmatmul.mubr.bf16.vlgmr.msra.gmra.mxu0 %v1078_v32 }
 0x6f0   :  { %v1457_v22 = vpop.f32.mrf.mxu1  ;;  %v1498_v40 = vpop.f32.mrf.mxu0 }
 0x6f1   :  { %v1458_v41 = vadd.f32 %v1457_v22, %v1086_v36  ;;  %v1499_v42 = vadd.f32 %v1498_v40, %v1094_v37 }
 0x6f2   :  { %v1459_v43 = vpop.f32.mrf.mxu1  ;;  %v1500_v44 = vpop.f32.mrf.mxu0 }
 0x6f3   :  { %v3784_v45 = vmax.f32 %v1458_v41, 0.0  ;;  %v3786_v46 = vmax.f32 %v1499_v42, 0.0  ;;  %v1460_v47 = vadd.f32 %v1459_v43, %v1090_v38  ;;  %v1501_v48 = vadd.f32 %v1500_v44, %v1098_v39 }
 0x6f4   :  { %v1461_v49 = vpop.f32.mrf.mxu1  ;;  %v1502_v50 = vpop.f32.mrf.mxu0 }
 0x6f5   :  { %v3788_v51 = vmax.f32 %v1460_v47, 0.0  ;;  %v3790_v52 = vmax.f32 %v1501_v48, 0.0 }
 0x6f6   :  { %v1462_v53 = vpop.f32.mrf.mxu1  ;;  %v1503_v54 = vpop.f32.mrf.mxu0 }
 0x6f7   :  { %3568 = dma.done.wait [#allocation4 + $0x1], 16384 }
 0x6f8   :  { %3569 = vsyncadd [#allocation4 + $0x1], 4294950912  ;;  %v3794_v55 = vpack.c.bf16 %v3788_v51, %v3788_v51  ;;  %v3798_v56 = vpack.c.bf16 %v3790_v52, %v3790_v52  ;;  %3139 = vset.pattern.permute.xlu0 %v3587_v17  ;;  %v3140_v57 = vld [vmem:[#allocation3 + $0xe4] ss:$16 sps:$4 sm:$0xff]   ;;  %v3144_v59 = vld [vmem:[#allocation3 + $0xe0] ss:$16 sps:$4 sm:$0xff]  }
 0x6f9   :  { %v3142_v58 = vld [vmem:[#allocation3 + $0x2e4] ss:$16 sps:$4 sm:$0xff]   ;;  %2308 = vmatprep.subr.bf16.mxu1 %v3140_v57  ;;  %v3145_v61 = vld [vmem:[#allocation3 + $0x2e0] ss:$16 sps:$4 sm:$0xff]   ;;  %vm2536_vm4 = vcmask 7168  }
 0x6fa   :  { %2340 = vmatprep.mubr.bf16.mxu1 %v3794_v55  ;;  %2381 = vmatprep.mubr.bf16.mxu0 %v3798_v56  ;;  %v3146_v63 = vld [vmem:[#allocation3 + $0xc4] ss:$16 sps:$4 sm:$0xff]   ;;  %v3150_v60 = vld [vmem:[#allocation3 + $0xc0] ss:$16 sps:$4 sm:$0xff]  }
 0x6fb   :  { %2349 = vmatprep.subr.bf16.mxu0 %v3142_v58  ;;  %2309 = vmatpush1.bf16.msra.mxu1 %v3144_v59  ;;  %v3148_v0 = vld [vmem:[#allocation3 + $0x2c4] ss:$16 sps:$4 sm:$0xff]   ;;  %v3151_v2 = vld [vmem:[#allocation3 + $0x2c0] ss:$16 sps:$4 sm:$0xff]  }
 0x6fc   :  { %2350 = vmatpush1.bf16.msra.mxu0 %v3145_v61  ;;  %2310 = vmatprep.subr.bf16.mxu1 %v3146_v63  ;;  %v3152_v1 = vld [vmem:[#allocation3 + $0xa4] ss:$16 sps:$4 sm:$0xff]   ;;  %v3156_v3 = vld [vmem:[#allocation3 + $0xa0] ss:$16 sps:$4 sm:$0xff]  }
 0x6fd   :  { %2351 = vmatprep.subr.bf16.mxu0 %v3148_v0  ;;  %v3154_v17 = vld [vmem:[#allocation3 + $0x2a4] ss:$16 sps:$4 sm:$0xff]   ;;  %v3157_v4 = vld [vmem:[#allocation3 + $0x2a0] ss:$16 sps:$4 sm:$0xff]  }
 0x6fe   :  { %v3158_v5 = vld [vmem:[#allocation3 + $0x84] ss:$16 sps:$4 sm:$0xff]   ;;  %v3162_v7 = vld [vmem:[#allocation3 + $0x80] ss:$16 sps:$4 sm:$0xff]  }
 0x6ff   :  { %2311 = vmatpush1.bf16.msra.mxu1 %v3150_v60  ;;  %v3160_v6 = vld [vmem:[#allocation3 + $0x284] ss:$16 sps:$4 sm:$0xff]   ;;  %v3163_v8 = vld [vmem:[#allocation3 + $0x280] ss:$16 sps:$4 sm:$0xff]  }
 0x700   :  { %2352 = vmatpush1.bf16.msra.mxu0 %v3151_v2  ;;  %2312 = vmatprep.subr.bf16.mxu1 %v3152_v1  ;;  %v3164_v9 = vld [vmem:[#allocation3 + $0x64] ss:$16 sps:$4 sm:$0xff]   ;;  %v3168_v13 = vld [vmem:[#allocation3 + $0x60] ss:$16 sps:$4 sm:$0xff]  }
 0x701   :  { %2353 = vmatprep.subr.bf16.mxu0 %v3154_v17  ;;  %v3166_v12 = vld [vmem:[#allocation3 + $0x264] ss:$16 sps:$4 sm:$0xff]   ;;  %v3169_v14 = vld [vmem:[#allocation3 + $0x260] ss:$16 sps:$4 sm:$0xff]  }
 0x702   :  { %v3170_v15 = vld [vmem:[#allocation3 + $0x44] ss:$16 sps:$4 sm:$0xff]   ;;  %v3174_v18 = vld [vmem:[#allocation3 + $0x40] ss:$16 sps:$4 sm:$0xff]  }
 0x703   :  { %2313 = vmatpush1.bf16.msra.mxu1 %v3156_v3  ;;  %v3172_v16 = vld [vmem:[#allocation3 + $0x244] ss:$16 sps:$4 sm:$0xff]   ;;  %v3175_v19 = vld [vmem:[#allocation3 + $0x240] ss:$16 sps:$4 sm:$0xff]  }
 0x704   :  { %2354 = vmatpush1.bf16.msra.mxu0 %v3157_v4  ;;  %2314 = vmatprep.subr.bf16.mxu1 %v3158_v5  ;;  %v3176_v20 = vld [vmem:[#allocation3 + $0x24] ss:$16 sps:$4 sm:$0xff]   ;;  %v3180_v23 = vld [vmem:[#allocation3 + $0x20] ss:$16 sps:$4 sm:$0xff]   ;;  %v3238_v4 = vld [vmem:[#allocation3 + $0xec] ss:$16 sps:$4 sm:$0xff]  }
 0x705   :  { %2355 = vmatprep.subr.bf16.mxu0 %v3160_v6  ;;  %v3178_v21 = vld [vmem:[#allocation3 + $0x224] ss:$16 sps:$4 sm:$0xff]   ;;  %v3181_v24 = vld [vmem:[#allocation3 + $0x220] ss:$16 sps:$4 sm:$0xff]   ;;  %v3241_v5 = vld [vmem:[#allocation3 + $0x2ec] ss:$16 sps:$4 sm:$0xff]   ;;  %v3805_v6 = vpack.c.bf16 %v3784_v45, %v3784_v45 }
 0x706   :  { %v3182_v25 = vld [vmem:[#allocation3 + $0x4] ss:$16 sps:$4 sm:$0xff]   ;;  %v3186_v27 = vld [vmem:[#allocation3] ss:$16 sps:$4 sm:$0xff]  }
 0x707   :  { %2315 = vmatpush1.bf16.msra.mxu1 %v3162_v7  ;;  %v3184_v26 = vld [vmem:[#allocation3 + $0x204] ss:$16 sps:$4 sm:$0xff]   ;;  %v3187_v28 = vld [vmem:[#allocation3 + $0x200] ss:$16 sps:$4 sm:$0xff]   ;;  %v3809_v7 = vpack.c.bf16 %v3786_v46, %v3786_v46 }
 0x708   :  { %2356 = vmatpush1.bf16.msra.mxu0 %v3163_v8  ;;  %2316 = vmatprep.subr.bf16.mxu1 %v3164_v9  ;;  %v3188_v29 = vld [vmem:[#allocation3 + $0x1e4] ss:$16 sps:$4 sm:$0xff]   ;;  %v3192_v31 = vld [vmem:[#allocation3 + $0x1e0] ss:$16 sps:$4 sm:$0xff]   ;;  %v3236_v8 = vld [vmem:[#allocation3 + $0xe8] ss:$16 sps:$4 sm:$0xff]  }
 0x709   :  { %2357 = vmatprep.subr.bf16.mxu0 %v3166_v12  ;;  %v3190_v30 = vld [vmem:[#allocation3 + $0x3e4] ss:$16 sps:$4 sm:$0xff]   ;;  %v3193_v32 = vld [vmem:[#allocation3 + $0x3e0] ss:$16 sps:$4 sm:$0xff]   ;;  %v3239_v9 = vld [vmem:[#allocation3 + $0x2e8] ss:$16 sps:$4 sm:$0xff]  }
 0x70a   :  { %v3194_v34 = vld [vmem:[#allocation3 + $0x1c4] ss:$16 sps:$4 sm:$0xff]   ;;  %v3198_v37 = vld [vmem:[#allocation3 + $0x1c0] ss:$16 sps:$4 sm:$0xff]   ;;  %v3244_v12 = vld [vmem:[#allocation3 + $0xcc] ss:$16 sps:$4 sm:$0xff]  }
 0x70b   :  { %2317 = vmatpush1.bf16.msra.mxu1 %v3168_v13  ;;  %v3196_v36 = vld [vmem:[#allocation3 + $0x3c4] ss:$16 sps:$4 sm:$0xff]   ;;  %v3199_v38 = vld [vmem:[#allocation3 + $0x3c0] ss:$16 sps:$4 sm:$0xff]   ;;  %v3247_v13 = vld [vmem:[#allocation3 + $0x2cc] ss:$16 sps:$4 sm:$0xff]  }
 0x70c   :  { %2358 = vmatpush1.bf16.msra.mxu0 %v3169_v14  ;;  %2318 = vmatprep.subr.bf16.mxu1 %v3170_v15  ;;  %v3200_v39 = vld [vmem:[#allocation3 + $0x1a4] ss:$16 sps:$4 sm:$0xff]   ;;  %v3204_v40 = vld [vmem:[#allocation3 + $0x1a0] ss:$16 sps:$4 sm:$0xff]   ;;  %v3242_v14 = vld [vmem:[#allocation3 + $0xc8] ss:$16 sps:$4 sm:$0xff]  }
 0x70d   :  { %2359 = vmatprep.subr.bf16.mxu0 %v3172_v16  ;;  %v3202_v22 = vld [vmem:[#allocation3 + $0x3a4] ss:$16 sps:$4 sm:$0xff]   ;;  %v3205_v41 = vld [vmem:[#allocation3 + $0x3a0] ss:$16 sps:$4 sm:$0xff]   ;;  %v3245_v15 = vld [vmem:[#allocation3 + $0x2c8] ss:$16 sps:$4 sm:$0xff]  }
 0x70e   :  { %v3206_v42 = vld [vmem:[#allocation3 + $0x184] ss:$16 sps:$4 sm:$0xff]   ;;  %v3210_v44 = vld [vmem:[#allocation3 + $0x180] ss:$16 sps:$4 sm:$0xff]   ;;  %v3250_v16 = vld [vmem:[#allocation3 + $0xac] ss:$16 sps:$4 sm:$0xff]  }
 0x70f   :  { %2319 = vmatpush1.bf16.msra.mxu1 %v3174_v18  ;;  %v3208_v43 = vld [vmem:[#allocation3 + $0x384] ss:$16 sps:$4 sm:$0xff]   ;;  %v3211_v47 = vld [vmem:[#allocation3 + $0x380] ss:$16 sps:$4 sm:$0xff]   ;;  %v3253_v18 = vld [vmem:[#allocation3 + $0x2ac] ss:$16 sps:$4 sm:$0xff]  }
 0x710   :  { %2360 = vmatpush1.bf16.msra.mxu0 %v3175_v19  ;;  %2320 = vmatprep.subr.bf16.mxu1 %v3176_v20  ;;  %v3212_v48 = vld [vmem:[#allocation3 + $0x164] ss:$16 sps:$4 sm:$0xff]   ;;  %v3216_v50 = vld [vmem:[#allocation3 + $0x160] ss:$16 sps:$4 sm:$0xff]   ;;  %v3248_v19 = vld [vmem:[#allocation3 + $0xa8] ss:$16 sps:$4 sm:$0xff]  }
 0x711   :  { %2361 = vmatprep.subr.bf16.mxu0 %v3178_v21  ;;  %v3214_v49 = vld [vmem:[#allocation3 + $0x364] ss:$16 sps:$4 sm:$0xff]   ;;  %v3217_v53 = vld [vmem:[#allocation3 + $0x360] ss:$16 sps:$4 sm:$0xff]   ;;  %v3251_v20 = vld [vmem:[#allocation3 + $0x2a8] ss:$16 sps:$4 sm:$0xff]  }
 0x712   :  { %v3218_v54 = vld [vmem:[#allocation3 + $0x144] ss:$16 sps:$4 sm:$0xff]   ;;  %v3222_v58 = vld [vmem:[#allocation3 + $0x140] ss:$16 sps:$4 sm:$0xff]   ;;  %v3256_v21 = vld [vmem:[#allocation3 + $0x8c] ss:$16 sps:$4 sm:$0xff]  }
 0x713   :  { %2321 = vmatpush1.bf16.msra.mxu1 %v3180_v23  ;;  %v3220_v57 = vld [vmem:[#allocation3 + $0x344] ss:$16 sps:$4 sm:$0xff]   ;;  %v3223_v59 = vld [vmem:[#allocation3 + $0x340] ss:$16 sps:$4 sm:$0xff]   ;;  %v3259_v23 = vld [vmem:[#allocation3 + $0x28c] ss:$16 sps:$4 sm:$0xff]  }
 0x714   :  { %2362 = vmatpush1.bf16.msra.mxu0 %v3181_v24  ;;  %2322 = vmatprep.subr.bf16.mxu1 %v3182_v25  ;;  %v3224_v61 = vld [vmem:[#allocation3 + $0x124] ss:$16 sps:$4 sm:$0xff]   ;;  %v3228_v0 = vld [vmem:[#allocation3 + $0x120] ss:$16 sps:$4 sm:$0xff]   ;;  %v3254_v24 = vld [vmem:[#allocation3 + $0x88] ss:$16 sps:$4 sm:$0xff]  }
 0x715   :  { %2363 = vmatprep.subr.bf16.mxu0 %v3184_v26  ;;  %v3226_v63 = vld [vmem:[#allocation3 + $0x324] ss:$16 sps:$4 sm:$0xff]   ;;  %v3229_v60 = vld [vmem:[#allocation3 + $0x320] ss:$16 sps:$4 sm:$0xff]   ;;  %v3257_v25 = vld [vmem:[#allocation3 + $0x288] ss:$16 sps:$4 sm:$0xff]  }
 0x716   :  { %v3230_v2 = vld [vmem:[#allocation3 + $0x104] ss:$16 sps:$4 sm:$0xff]   ;;  %v3234_v17 = vld [vmem:[#allocation3 + $0x100] ss:$16 sps:$4 sm:$0xff]   ;;  %v3262_v26 = vld [vmem:[#allocation3 + $0x6c] ss:$16 sps:$4 sm:$0xff]  }
 0x717   :  { %2323 = vmatpush1.bf16.msra.mxu1 %v3186_v27  ;;  %v3232_v1 = vld [vmem:[#allocation3 + $0x304] ss:$16 sps:$4 sm:$0xff]   ;;  %v3235_v3 = vld [vmem:[#allocation3 + $0x300] ss:$16 sps:$4 sm:$0xff]   ;;  %v3265_v27 = vld [vmem:[#allocation3 + $0x26c] ss:$16 sps:$4 sm:$0xff]  }
 0x718   :  { %2364 = vmatpush1.bf16.msra.mxu0 %v3187_v28  ;;  %2324 = vmatprep.subr.bf16.mxu1 %v3188_v29  ;;  %v3260_v28 = vld [vmem:[#allocation3 + $0x68] ss:$16 sps:$4 sm:$0xff]   ;;  %v3271_v29 = vld [vmem:[#allocation3 + $0x24c] ss:$16 sps:$4 sm:$0xff]  }
 0x719   :  { %2365 = vmatprep.subr.bf16.mxu0 %v3190_v30  ;;  %v3266_v30 = vld [vmem:[#allocation3 + $0x48] ss:$16 sps:$4 sm:$0xff]  }
 0x71b   :  { %2325 = vmatpush2.bf16.msra.mxu1 %v3192_v31  ;;  %v3269_v31 = vld [vmem:[#allocation3 + $0x248] ss:$16 sps:$4 sm:$0xff]  }
 0x71c   :  { %2366 = vmatpush2.bf16.msra.mxu0 %v3193_v32  ;;  %2326 = vmatprep.subr.bf16.mxu1 %v3194_v34  ;;  %v3274_v32 = vld [vmem:[#allocation3 + $0x2c] ss:$16 sps:$4 sm:$0xff]  }
 0x71d   :  { %2367 = vmatprep.subr.bf16.mxu0 %v3196_v36  ;;  %v3277_v34 = vld [vmem:[#allocation3 + $0x22c] ss:$16 sps:$4 sm:$0xff]   ;;  %v3272_v36 = vld [vmem:[#allocation3 + $0x28] ss:$16 sps:$4 sm:$0xff]  }
 0x71f   :  { %2327 = vmatpush2.bf16.msra.mxu1 %v3198_v37  ;;  %v3275_v37 = vld [vmem:[#allocation3 + $0x228] ss:$16 sps:$4 sm:$0xff]  }
 0x720   :  { %2368 = vmatpush2.bf16.msra.mxu0 %v3199_v38  ;;  %2328 = vmatprep.subr.bf16.mxu1 %v3200_v39  ;;  %v3280_v38 = vld [vmem:[#allocation3 + $0xc] ss:$16 sps:$4 sm:$0xff]  }
 0x721   :  { %2369 = vmatprep.subr.bf16.mxu0 %v3202_v22  ;;  %v3283_v39 = vld [vmem:[#allocation3 + $0x20c] ss:$16 sps:$4 sm:$0xff]   ;;  %v3278_v22 = vld [vmem:[#allocation3 + $0x8] ss:$16 sps:$4 sm:$0xff]  }
 0x723   :  { %2329 = vmatpush2.bf16.msra.mxu1 %v3204_v40  ;;  %v3281_v40 = vld [vmem:[#allocation3 + $0x208] ss:$16 sps:$4 sm:$0xff]  }
 0x724   :  { %2370 = vmatpush2.bf16.msra.mxu0 %v3205_v41  ;;  %2330 = vmatprep.subr.bf16.mxu1 %v3206_v42  ;;  %v3286_v41 = vld [vmem:[#allocation3 + $0x1ec] ss:$16 sps:$4 sm:$0xff]  }
 0x725   :  { %2371 = vmatprep.subr.bf16.mxu0 %v3208_v43  ;;  %v3289_v42 = vld [vmem:[#allocation3 + $0x3ec] ss:$16 sps:$4 sm:$0xff]   ;;  %v3284_v43 = vld [vmem:[#allocation3 + $0x1e8] ss:$16 sps:$4 sm:$0xff]  }
 0x727   :  { %2331 = vmatpush2.bf16.msra.mxu1 %v3210_v44  ;;  %v3287_v44 = vld [vmem:[#allocation3 + $0x3e8] ss:$16 sps:$4 sm:$0xff]  }
 0x728   :  { %2372 = vmatpush2.bf16.msra.mxu0 %v3211_v47  ;;  %2332 = vmatprep.subr.bf16.mxu1 %v3212_v48  ;;  %v3292_v47 = vld [vmem:[#allocation3 + $0x1cc] ss:$16 sps:$4 sm:$0xff]  }
 0x729   :  { %2373 = vmatprep.subr.bf16.mxu0 %v3214_v49  ;;  %v3295_v48 = vld [vmem:[#allocation3 + $0x3cc] ss:$16 sps:$4 sm:$0xff]   ;;  %v3290_v49 = vld [vmem:[#allocation3 + $0x1c8] ss:$16 sps:$4 sm:$0xff]  }
 0x72b   :  { %2333 = vmatpush2.bf16.msra.mxu1 %v3216_v50  ;;  %v3293_v50 = vld [vmem:[#allocation3 + $0x3c8] ss:$16 sps:$4 sm:$0xff]  }
 0x72c   :  { %2374 = vmatpush2.bf16.msra.mxu0 %v3217_v53  ;;  %2334 = vmatprep.subr.bf16.mxu1 %v3218_v54  ;;  %v3298_v53 = vld [vmem:[#allocation3 + $0x1ac] ss:$16 sps:$4 sm:$0xff]  }
 0x72d   :  { %2375 = vmatprep.subr.bf16.mxu0 %v3220_v57  ;;  %v3301_v54 = vld [vmem:[#allocation3 + $0x3ac] ss:$16 sps:$4 sm:$0xff]   ;;  %v3296_v57 = vld [vmem:[#allocation3 + $0x1a8] ss:$16 sps:$4 sm:$0xff]  }
 0x72f   :  { %2335 = vmatpush2.bf16.msra.mxu1 %v3222_v58  ;;  %v3299_v58 = vld [vmem:[#allocation3 + $0x3a8] ss:$16 sps:$4 sm:$0xff]  }
 0x730   :  { %2376 = vmatpush2.bf16.msra.mxu0 %v3223_v59  ;;  %2336 = vmatprep.subr.bf16.mxu1 %v3224_v61  ;;  %v3304_v59 = vld [vmem:[#allocation3 + $0x18c] ss:$16 sps:$4 sm:$0xff]  }
 0x731   :  { %2377 = vmatprep.subr.bf16.mxu0 %v3226_v63  ;;  %v3307_v61 = vld [vmem:[#allocation3 + $0x38c] ss:$16 sps:$4 sm:$0xff]   ;;  %v3302_v63 = vld [vmem:[#allocation3 + $0x188] ss:$16 sps:$4 sm:$0xff]  }
 0x733   :  { %2337 = vmatpush2.bf16.msra.mxu1 %v3228_v0  ;;  %v3305_v0 = vld [vmem:[#allocation3 + $0x388] ss:$16 sps:$4 sm:$0xff]  }
 0x734   :  { %2378 = vmatpush2.bf16.msra.mxu0 %v3229_v60  ;;  %2338 = vmatprep.subr.bf16.mxu1 %v3230_v2  ;;  %v3310_v60 = vld [vmem:[#allocation3 + $0x16c] ss:$16 sps:$4 sm:$0xff]  }
 0x735   :  { %2379 = vmatprep.subr.bf16.mxu0 %v3232_v1  ;;  %v3313_v2 = vld [vmem:[#allocation3 + $0x36c] ss:$16 sps:$4 sm:$0xff]   ;;  %v3308_v1 = vld [vmem:[#allocation3 + $0x168] ss:$16 sps:$4 sm:$0xff]  }
 0x737   :  { %2339 = vmatpush2.bf16.msra.mxu1 %v3234_v17  ;;  %v3311_v17 = vld [vmem:[#allocation3 + $0x368] ss:$16 sps:$4 sm:$0xff]  }
 0x738   :  { %2380 = vmatpush2.bf16.msra.mxu0 %v3235_v3  ;;  %2390 = vmatprep.subr.bf16.mxu1 %v3238_v4  ;;  %v3316_v3 = vld [vmem:[#allocation3 + $0x14c] ss:$16 sps:$4 sm:$0xff]  }
 0x739   :  { %2431 = vmatprep.subr.bf16.mxu0 %v3241_v5  ;;  %v3319_v4 = vld [vmem:[#allocation3 + $0x34c] ss:$16 sps:$4 sm:$0xff]   ;;  %v3314_v5 = vld [vmem:[#allocation3 + $0x148] ss:$16 sps:$4 sm:$0xff]  }
 0x73a   :  { %2341 = vmatmul.mubr.bf16.vlgmr.msra.gmra.mxu1 %v3805_v6 }
 0x73b   :  { %2382 = vmatmul.mubr.bf16.vlgmr.msra.gmra.mxu0 %v3809_v7  ;;  %2391 = vmatpush1.bf16.msra.mxu1 %v3236_v8  ;;  %v3317_v8 = vld [vmem:[#allocation3 + $0x348] ss:$16 sps:$4 sm:$0xff]  }
 0x73c   :  { %2432 = vmatpush1.bf16.msra.mxu0 %v3239_v9  ;;  %2392 = vmatprep.subr.bf16.mxu1 %v3244_v12  ;;  %v3322_v9 = vld [vmem:[#allocation3 + $0x12c] ss:$16 sps:$4 sm:$0xff]  }
 0x73d   :  { %2433 = vmatprep.subr.bf16.mxu0 %v3247_v13  ;;  %2422 = vmatprep.mubr.bf16.mxu1 %v3794_v55  ;;  %v3263_v55 = vld [vmem:[#allocation3 + $0x268] ss:$16 sps:$4 sm:$0xff]   ;;  %v3325_v12 = vld [vmem:[#allocation3 + $0x32c] ss:$16 sps:$4 sm:$0xff]  }
 0x73e   :  { %2463 = vmatprep.mubr.bf16.mxu0 %v3798_v56  ;;  %v3268_v56 = vld [vmem:[#allocation3 + $0x4c] ss:$16 sps:$4 sm:$0xff]   ;;  %v3320_v13 = vld [vmem:[#allocation3 + $0x128] ss:$16 sps:$4 sm:$0xff]  }
 0x73f   :  { %2393 = vmatpush1.bf16.msra.mxu1 %v3242_v14  ;;  %v3323_v14 = vld [vmem:[#allocation3 + $0x328] ss:$16 sps:$4 sm:$0xff]  }
 0x740   :  { %2434 = vmatpush1.bf16.msra.mxu0 %v3245_v15  ;;  %2394 = vmatprep.subr.bf16.mxu1 %v3250_v16  ;;  %v3328_v15 = vld [vmem:[#allocation3 + $0x10c] ss:$16 sps:$4 sm:$0xff]  }
 0x741   :  { %2435 = vmatprep.subr.bf16.mxu0 %v3253_v18  ;;  %v3331_v16 = vld [vmem:[#allocation3 + $0x30c] ss:$16 sps:$4 sm:$0xff]   ;;  %v3326_v18 = vld [vmem:[#allocation3 + $0x108] ss:$16 sps:$4 sm:$0xff]  }
 0x743   :  { %2395 = vmatpush1.bf16.msra.mxu1 %v3248_v19  ;;  %v3329_v19 = vld [vmem:[#allocation3 + $0x308] ss:$16 sps:$4 sm:$0xff]  }
 0x744   :  { %2436 = vmatpush1.bf16.msra.mxu0 %v3251_v20  ;;  %2396 = vmatprep.subr.bf16.mxu1 %v3256_v21 }
 0x745   :  { %2437 = vmatprep.subr.bf16.mxu0 %v3259_v23 }
 0x747   :  { %2397 = vmatpush1.bf16.msra.mxu1 %v3254_v24 }
 0x748   :  { %2438 = vmatpush1.bf16.msra.mxu0 %v3257_v25  ;;  %2398 = vmatprep.subr.bf16.mxu1 %v3262_v26 }
 0x749   :  { %2439 = vmatprep.subr.bf16.mxu0 %v3265_v27 }
 0x74b   :  { %2399 = vmatpush1.bf16.msra.mxu1 %v3260_v28 }
 0x74c   :  { %2440 = vmatpush1.bf16.msra.mxu0 %v3263_v55  ;;  %2400 = vmatprep.subr.bf16.mxu1 %v3268_v56  ;;  %v1646_v55 = vld [vmem:[#allocation19 + $0x20] ss:$8 sm:$0xf] }
 0x74d   :  { %2441 = vmatprep.subr.bf16.mxu0 %v3271_v29  ;;  %v1651_v56 = vrot.slane %v1646_v55, %v3727_v11  ;;  %v1655_v29 = vrot.slane %v1646_v55, %v3759_v62  ;;  %v1663_v62 = vrot.slane %v1646_v55, %v1097_v35 }
 0x74f   :  { %2401 = vmatpush1.bf16.msra.mxu1 %v3266_v30 }
 0x750   :  { %2442 = vmatpush1.bf16.msra.mxu0 %v3269_v31  ;;  %2402 = vmatprep.subr.bf16.mxu1 %v3274_v32 }
 0x751   :  { %2443 = vmatprep.subr.bf16.mxu0 %v3277_v34 }
 0x753   :  { %2403 = vmatpush1.bf16.msra.mxu1 %v3272_v36 }
 0x754   :  { %2444 = vmatpush1.bf16.msra.mxu0 %v3275_v37  ;;  %2404 = vmatprep.subr.bf16.mxu1 %v3280_v38  ;;  %v2493_v37 = vsub.s32 4, %v3724_v10 }
 0x755   :  { %2445 = vmatprep.subr.bf16.mxu0 %v3283_v39 }
 0x757   :  { %2405 = vmatpush1.bf16.msra.mxu1 %v3278_v22 }
 0x758   :  { %2446 = vmatpush1.bf16.msra.mxu0 %v3281_v40  ;;  %2406 = vmatprep.subr.bf16.mxu1 %v3286_v41  ;;  %v1659_v40 = vrot.slane %v1646_v55, %v3776_v33  ;;  %v2497_v41 = vsub.s32 6, %v3724_v10 }
 0x759   :  { %2447 = vmatprep.subr.bf16.mxu0 %v3289_v42 }
 0x75b   :  { %2407 = vmatpush2.bf16.msra.mxu1 %v3284_v43 }
 0x75c   :  { %2448 = vmatpush2.bf16.msra.mxu0 %v3287_v44  ;;  %2408 = vmatprep.subr.bf16.mxu1 %v3292_v47 }
 0x75d   :  { %2449 = vmatprep.subr.bf16.mxu0 %v3295_v48 }
 0x75f   :  { %2409 = vmatpush2.bf16.msra.mxu1 %v3290_v49 }
 0x760   :  { %2450 = vmatpush2.bf16.msra.mxu0 %v3293_v50  ;;  %2410 = vmatprep.subr.bf16.mxu1 %v3298_v53 }
 0x761   :  { %2451 = vmatprep.subr.bf16.mxu0 %v3301_v54 }
 0x763   :  { %2411 = vmatpush2.bf16.msra.mxu1 %v3296_v57 }
 0x764   :  { %2452 = vmatpush2.bf16.msra.mxu0 %v3299_v58  ;;  %2412 = vmatprep.subr.bf16.mxu1 %v3304_v59 }
 0x765   :  { %2453 = vmatprep.subr.bf16.mxu0 %v3307_v61 }
 0x767   :  { %2413 = vmatpush2.bf16.msra.mxu1 %v3302_v63 }
 0x768   :  { %2454 = vmatpush2.bf16.msra.mxu0 %v3305_v0  ;;  %2414 = vmatprep.subr.bf16.mxu1 %v3310_v60 }
 0x769   :  { %2455 = vmatprep.subr.bf16.mxu0 %v3313_v2 }
 0x76b   :  { %2415 = vmatpush2.bf16.msra.mxu1 %v3308_v1 }
 0x76c   :  { %2456 = vmatpush2.bf16.msra.mxu0 %v3311_v17  ;;  %2416 = vmatprep.subr.bf16.mxu1 %v3316_v3 }
 0x76d   :  { %2457 = vmatprep.subr.bf16.mxu0 %v3319_v4 }
 0x76f   :  { %2417 = vmatpush2.bf16.msra.mxu1 %v3314_v5 }
 0x770   :  { %2458 = vmatpush2.bf16.msra.mxu0 %v3317_v8  ;;  %2418 = vmatprep.subr.bf16.mxu1 %v3322_v9 }
 0x771   :  { %2459 = vmatprep.subr.bf16.mxu0 %v3325_v12 }
 0x773   :  { %2419 = vmatpush2.bf16.msra.mxu1 %v3320_v13 }
 0x774   :  { %2460 = vmatpush2.bf16.msra.mxu0 %v3323_v14  ;;  %2420 = vmatprep.subr.bf16.mxu1 %v3328_v15  ;;  %v2847_v14 = vld [vmem:[#allocation5] ss:$0 sm:$0xff] }
 0x775   :  { %2461 = vmatprep.subr.bf16.mxu0 %v3331_v16 }
 0x777   :  { %2421 = vmatpush2.bf16.msra.mxu1 %v3326_v18 }
 0x778   :  { %2462 = vmatpush2.bf16.msra.mxu0 %v3329_v19 }
 0x77a   :  { %2423 = vmatmul.mubr.bf16.vlgmr.msra.gmra.mxu1 %v3805_v6  ;;  %v2480_v6 = vld [vmem:[%s3851_s11] sm:$0xf] }
 0x77b   :  { %2464 = vmatmul.mubr.bf16.vlgmr.msra.gmra.mxu0 %v3809_v7  ;;  %v2481_v7 = vunpack.c.l.bf16 %v2480_v6 }
 0x77d   :  { %v2486_v36 = vrot.slane %v2481_v7, %v3727_v11  ;;  %v2490_v22 = vrot.slane %v2481_v7, %v3776_v33  ;;  %v2494_v47 = vrot.slane %v2481_v7, %v2493_v37  ;;  %v2498_v59 = vrot.slane %v2481_v7, %v2497_v41 }
 0x77f   :  { %v2506_v42 = vrot.slane %v2486_v36, %v3727_v11  ;;  %v2510_v50 = vrot.slane %v2490_v22, %v3727_v11  ;;  %v2514_v35 = vrot.slane %v2494_v47, %v3727_v11  ;;  %v2518_v3 = vrot.slane %v2498_v59, %v3727_v11 }
 0x7fa   :  { %v2342_v20 = vpop.f32.mrf.mxu1 }
 0x7fb   :  { %v2383_v21 = vpop.f32.mrf.mxu0  ;;  %v2343_v30 = vadd.f32 %v2342_v20, %v1651_v56 }
 0x7fc   :  { %v2344_v23 = vpop.f32.mrf.mxu1 }
 0x7fd   :  { %v2385_v24 = vpop.f32.mrf.mxu0  ;;  %v2345_v31 = vadd.f32 %v2344_v23, %v1655_v29  ;;  %v2384_v32 = vadd.f32 %v2383_v21, %v2343_v30 }
 0x7fe   :  { %v2346_v25 = vpop.f32.mrf.mxu1 }
 0x7ff   :  { %v2387_v26 = vpop.f32.mrf.mxu0  ;;  %v2386_v34 = vadd.f32 %v2385_v24, %v2345_v31  ;;  %v2472_v38 = vmax.f32 %v2384_v32, 0.0 }
 0x800   :  { %v2347_v27 = vpop.f32.mrf.mxu1 }
 0x801   :  { %v2388_v28 = vpop.f32.mrf.mxu0  ;;  %v2473_v39 = vmax.f32 %v2386_v34, 0.0  ;;  %v2476_v48 = vadd.f32 %v2472_v38, %v3784_v45 }
 0x803   :  { %v2477_v49 = vadd.f32 %v2473_v39, %v3788_v51  ;;  %v2519_v63 = vmul.f32 %v2506_v42, %v2476_v48 }
 0x805   :  { %v2520_v0 = vmul.f32 %v2510_v50, %v2477_v49 }
 0x807   :  { %v2523_v8 = vadd.f32 %v2520_v0, %v2519_v63 }
 0x83a   :  { %v2424_v43 = vpop.f32.mrf.mxu1 }
 0x83b   :  { %v2465_v44 = vpop.f32.mrf.mxu0  ;;  %v2425_v53 = vadd.f32 %v2424_v43, %v1659_v40 }
 0x83c   :  { %v2426_v54 = vpop.f32.mrf.mxu1 }
 0x83d   :  { %v2467_v57 = vpop.f32.mrf.mxu0  ;;  %v2466_v33 = vadd.f32 %v2465_v44, %v2425_v53  ;;  %v2427_v58 = vadd.f32 %v2426_v54, %v1663_v62 }
 0x83e   :  { %v2428_v10 = vpop.f32.mrf.mxu1 }
 0x83f   :  { %v2469_v61 = vpop.f32.mrf.mxu0  ;;  %v2474_v60 = vmax.f32 %v2466_v33, 0.0  ;;  %v2468_v2 = vadd.f32 %v2467_v57, %v2427_v58 }
 0x840   :  { %v2429_v1 = vpop.f32.mrf.mxu1 }
 0x841   :  { %v2470_v45 = vpop.f32.mrf.mxu0  ;;  %v2478_v51 = vadd.f32 %v2474_v60, %v3786_v46  ;;  %v2475_v17 = vmax.f32 %v2468_v2, 0.0 }
 0x843   :  { %v2521_v4 = vmul.f32 %v2514_v35, %v2478_v51  ;;  %v2479_v5 = vadd.f32 %v2475_v17, %v3790_v52 }
 0x845   :  { %v2522_v9 = vmul.f32 %v2518_v3, %v2479_v5  ;;  %v2524_v12 = vadd.f32 %v2523_v8, %v2521_v4 }
 0x847   :  { %v2525_v13 = vadd.f32 %v2524_v12, %v2522_v9 }
 0x849   :  { %2526 = vadd.xlane.f32.xlu0 %v2525_v13 }
 0x8d2   :  { %v2527_v15 = vpop.xlane.xlu0 %2526 }
 0x8d3   :  { %v2535_v16 = vadd.f32 %v2847_v14, %v2527_v15 }
 0x8d5   :  { %v2537_v18 = vsel %vm2536_vm4, %v2535_v16, -inf }
 0x8d6   :  { %v2538_v19 = vrot.slane %v2537_v18, 4 }
 0x8d8   :  { %v2539_v20 = vmax.f32 %v2537_v18, %v2538_v19 }
 0x8da   :  { %v2540_v21 = vrot.slane %v2539_v20, 2 }
 0x8dc   :  { %v2541_v46 = vmax.f32 %v2539_v20, %v2540_v21 }
 0x8de   :  { %v2542_v23 = vrot.slane %v2541_v46, 1 }
 0x8e0   :  { %v2543_v24 = vmax.f32 %v2541_v46, %v2542_v23 }
 0x8e2   :  { %v2544_v11 = vsub.f32 %v2535_v16, %v2543_v24 }
 0x8e4   :  { %v2545_v25 = vmul.f32 1.442695, %v2544_v11 }
 0x8e6   :  { %3332 = vpow2.f32 %v2545_v25 }
 0x8f3   :  { %v3333_v52 = vpop.eup %3332 }
 0x8f4   :  { %v2547_v26 = vsel %vm2536_vm4, %v3333_v52, 0.0 }
 0x8f5   :  { %v2548_v27 = vrot.slane %v2547_v26, 4 }
 0x8f7   :  { %v2549_v28 = vadd.f32 %v2548_v27, %v2547_v26 }
 0x8f9   :  { %v2550_v55 = vrot.slane %v2549_v28, 2 }
 0x8fb   :  { %v2551_v56 = vadd.f32 %v2550_v55, %v2549_v28 }
 0x8fd   :  { %v2552_v29 = vrot.slane %v2551_v56, 1 }
 0x8ff   :  { %v2553_v30 = vadd.f32 %v2552_v29, %v2551_v56 }
 0x901   :  { %3334 = vrcp.f32 %v2553_v30 }
 0x90e   :  { %v3335_v6 = vpop.eup %3334 }
 0x90f   :  { %v2555_v31 = vmul.f32 %v3335_v6, %v3333_v52 }
 0x911   :  { %2558 = vperm.xlu0 %3139, %v2555_v31  }
 0x98c   :  { %v2559_v7 = vpop.permute.xlu0 %2558 }
 0x98d   :  { %2561 = vst [vmem:[%s3853_s13] sm:$0xff] %v2559_v7 }
 0x98e   :  { %2566 = vsyncpa [#allocation7], 1 }
 0x98f   :  { %2567 = vsyncpa [#allocation9], 1 }
 0x990   :  { %2568 = vsyncpa [#allocation12], 1 }
 0x991   :  { %2569 = vsyncpa [#allocation15], 1 }
 0x992   :  { %2570 = vsyncpa [#allocation18], 1 }
 0x993   :  { %2571 = vsyncmov [#allocation4] }
 0x996   :  { %s2572_s23 = vpop.sfrf %2571 }
 0x997   :  { %p2848_p13 = scmp.ne.s32.totalorder %s2572_s23, 0 }
 0x999   :  { %2576 = shalt.err (%p2848_p13)  }
 0x99a   :  { %2578 = vsyncmov [#allocation4 + $0x1] }
 0x99d   :  { %s2579_s0 = vpop.sfrf %2578 }
 0x99e   :  { %p2849_p0 = scmp.ne.s32.totalorder %s2579_s0, 0 }
 0x9a0   :  { %2583 = shalt.err (%p2849_p0)  }

</bundles_post_ra>
